<compile_context>
chip_gen: v7x
topology: tpu7x:2x2x1
jax: 0.10.0
libtpu: 0.0.40
codegen_flags: <defaults>
</compile_context>

<pallas_src>
import jax
import jax.numpy as jnp
from jax.experimental import pallas as pl
from jax.experimental.pallas import tpu as pltpu

EPS = 1e-5


def _layernorm(v, gamma, beta):
    # v: (TQ, K) f32 ; gamma/beta: (1, K) f32
    mean = jnp.mean(v, axis=-1, keepdims=True)
    var = jnp.mean((v - mean) ** 2, axis=-1, keepdims=True)
    return (v - mean) * jax.lax.rsqrt(var + EPS) * gamma + beta


def transformer_block_kernel(
    x_ref,                      # (TQ, K)     f32   residual tile
    q_ref,                      # (H, TQ, K)  bf16  (already scaled by 1/sqrt(K))
    k_ref,                      # (H, TK, K)  bf16
    v_ref,                      # (H, TK, K)  bf16
    wu_ref, bu_ref,             # (H, K, K) bf16 , (1, K) f32
    g1_ref, be1_ref,            # LayerNorm 1: (1, K) f32 each
    w1_ref, bf1_ref,            # FF in : (K, 4K) bf16, (1, 4K) f32
    w2_ref, bf2_ref,            # FF out: (4K, K) bf16, (1, K) f32
    g2_ref, be2_ref,            # LayerNorm 2: (1, K) f32 each
    o_ref,                      # (TQ, K) output tile
    m_scr, l_scr, acc_scr,      # (H,TQ,1) f32, (H,TQ,1) f32, (H,TQ,K) f32
):
    ki = pl.program_id(2)
    nk = pl.num_programs(2)
    H = q_ref.shape[0]

    @pl.when(ki == 0)
    def _():
        m_scr[...] = jnp.full(m_scr.shape, -jnp.inf, m_scr.dtype)
        l_scr[...] = jnp.zeros(l_scr.shape, l_scr.dtype)
        acc_scr[...] = jnp.zeros(acc_scr.shape, acc_scr.dtype)

    # All heads at once (batched over H).  Contraction over the trailing head
    # dim of both operands is the MXU-native "NT" flash form (no K transpose).
    s = jnp.einsum("hqd,hkd->hqk", q_ref[...], k_ref[...],
                   preferred_element_type=jnp.float32)            # (H,TQ,TK) f32

    m_prev = m_scr[...]
    m_new = jnp.maximum(m_prev, jnp.max(s, axis=-1, keepdims=True))
    alpha = jnp.exp(m_prev - m_new)
    p = jnp.exp(s - m_new)
    l_scr[...] = alpha * l_scr[...] + jnp.sum(p, axis=-1, keepdims=True)
    acc_scr[...] = alpha * acc_scr[...] + jnp.einsum(
        "hqk,hkd->hqd", p.astype(jnp.bfloat16), v_ref[...],
        preferred_element_type=jnp.float32)                       # (H,TQ,K) f32
    m_scr[...] = m_new

    @pl.when(ki == nk - 1)
    def _():
        # Softmax normalization applied once on the (H,TQ,K) context (EUP
        # reciprocal), not on the (H,TQ,TK) probabilities.
        inv_l = pl.reciprocal(l_scr[...], approx=True)
        ctx = (acc_scr[...] * inv_l).astype(jnp.bfloat16)         # (H, TQ, K)

        # Unify heads without re-laying (H,TQ,K) -> (TQ,H*K): accumulate
        # per-head (TQ,K)x(K,K) matmuls in f32.
        att = jnp.dot(ctx[0], wu_ref[0], preferred_element_type=jnp.float32)
        for h in range(1, H):
            att = att + jnp.dot(ctx[h], wu_ref[h],
                                preferred_element_type=jnp.float32)
        att = att + bu_ref[...]                                   # (TQ, K)

        # residual + LayerNorm 1
        x_tile = x_ref[...].astype(jnp.float32)
        x1 = _layernorm(att + x_tile, g1_ref[...], be1_ref[...])

        # feed forward: Linear(K,4K) -> ReLU -> Linear(4K,K)
        hid = jnp.dot(x1.astype(jnp.bfloat16), w1_ref[...],
                      preferred_element_type=jnp.float32) + bf1_ref[...]
        hid = jnp.maximum(hid, 0.0)
        ff = jnp.dot(hid.astype(jnp.bfloat16), w2_ref[...],
                     preferred_element_type=jnp.float32) + bf2_ref[...]

        # residual + LayerNorm 2
        out = _layernorm(ff + x1, g2_ref[...], be2_ref[...])
        o_ref[...] = out.astype(o_ref.dtype)


def _pick_tile(n):
    for t in (512, 256, 128):
        if n % t == 0:
            return t
    return n


def _vmem_limit_bytes():
    # Per-generation VMEM limit: capacity minus ~16 MiB headroom
    # (v5e/v6e: 128 MiB -> 112 MiB; v7x: 64 MiB -> 48 MiB).
    try:
        cap = int(pltpu.get_tpu_info().vmem_capacity_bytes)
    except Exception:
        return 48 * 1024 * 1024
    return int(min(cap, max(cap - 16 * 1024 * 1024, (3 * cap) // 4)))


def transformer_block(x, params, *, tq=None, tk=None):
    B, T, K = x.shape
    (wq, wk, wv, wu, bu, g1, be1, w1, bf1, w2, bf2, g2, be2) = params
    H = wq.shape[1] // K
    scale = 1.0 / (float(K) ** 0.5)   # == (K**-0.25 on q) * (K**-0.25 on k)

    tq = _pick_tile(T) if tq is None else tq
    tk = _pick_tile(T) if tk is None else tk
    assert T % tq == 0 and T % tk == 0, "T must be divisible by tile sizes"
    n_q, n_k = T // tq, T // tk

    bf = lambda a: a.astype(jnp.bfloat16)
    f32 = lambda a: a.astype(jnp.float32)

    # ---- Q/K/V projections hoisted out of the fused kernel (plain XLA). ----
    x_bf = bf(x)

    def proj(w):
        y = jnp.einsum("btk,kn->btn", x_bf, bf(w),
                       preferred_element_type=jnp.float32)        # (B, T, H*K)
        return y.reshape(B, T, H, K).transpose(0, 2, 1, 3)        # (B, H, T, K)

    q = bf(proj(wq) * scale)
    k = bf(proj(wk))
    v = bf(proj(wv))

    # Unify weight reshaped head-major so the kernel never relays the context.
    wu_r = bf(wu).reshape(H, K, K)
    weights = (wu_r, f32(bu), f32(g1), f32(be1),
               bf(w1), f32(bf1), bf(w2), f32(bf2), f32(g2), f32(be2))

    # Weight / bias blocks are full arrays with a constant index map, so
    # Pallas keeps them resident across the grid (no re-DMA).
    def const_spec(arr):
        nd = arr.ndim
        return pl.BlockSpec(arr.shape, lambda b, qi, ki, _nd=nd: (0,) * _nd)

    in_specs = [
        pl.BlockSpec((None, tq, K), lambda b, qi, ki: (b, qi, 0)),        # x
        pl.BlockSpec((None, H, tq, K), lambda b, qi, ki: (b, 0, qi, 0)),  # q
        pl.BlockSpec((None, H, tk, K), lambda b, qi, ki: (b, 0, ki, 0)),  # k
        pl.BlockSpec((None, H, tk, K), lambda b, qi, ki: (b, 0, ki, 0)),  # v
    ] + [const_spec(w) for w in weights]
    out_specs = pl.BlockSpec((None, tq, K), lambda b, qi, ki: (b, qi, 0))

    return pl.pallas_call(
        transformer_block_kernel,
        out_shape=jax.ShapeDtypeStruct((B, T, K), x.dtype),
        grid_spec=pltpu.PrefetchScalarGridSpec(
            num_scalar_prefetch=0,
            grid=(B, n_q, n_k),
            in_specs=in_specs,
            out_specs=out_specs,
            scratch_shapes=[
                pltpu.VMEM((H, tq, 1), jnp.float32),   # running max
                pltpu.VMEM((H, tq, 1), jnp.float32),   # running sum
                pltpu.VMEM((H, tq, K), jnp.float32),   # context accumulator
            ],
        ),
        compiler_params=pltpu.CompilerParams(
            dimension_semantics=("parallel", "parallel", "arbitrary"),
            vmem_limit_bytes=_vmem_limit_bytes(),
        ),
    )(x, q, k, v, *weights)


def make_params(key, k, heads):
    keys = jax.random.split(key, 8)
    s = 0.02
    wq = jax.random.normal(keys[0], (k, heads * k), jnp.float32) * s
    wk = jax.random.normal(keys[1], (k, heads * k), jnp.float32) * s
    wv = jax.random.normal(keys[2], (k, heads * k), jnp.float32) * s
    wu = jax.random.normal(keys[3], (heads * k, k), jnp.float32) * s
    bu = jnp.zeros((1, k), jnp.float32)
    g1 = jnp.ones((1, k), jnp.float32)
    be1 = jnp.zeros((1, k), jnp.float32)
    w1 = jax.random.normal(keys[4], (k, 4 * k), jnp.float32) * s
    bf1 = jax.random.normal(keys[5], (1, 4 * k), jnp.float32) * s
    w2 = jax.random.normal(keys[6], (4 * k, k), jnp.float32) * s
    bf2 = jax.random.normal(keys[7], (1, k), jnp.float32) * s
    g2 = jnp.ones((1, k), jnp.float32)
    be2 = jnp.zeros((1, k), jnp.float32)
    return (wq, wk, wv, wu, bu, g1, be1, w1, bf1, w2, bf2, g2, be2)


def reference_block(x, params):
    # Pure-JAX f32 reference with identical semantics (for validation).
    (wq, wk, wv, wu, bu, g1, be1, w1, bf1, w2, bf2, g2, be2) = params
    B, T, K = x.shape
    H = wq.shape[1] // K
    scale = 1.0 / (K ** 0.25)

    def proj(w):
        return (x @ w).reshape(B, T, H, K).transpose(0, 2, 1, 3)  # (B,H,T,K)

    q, k_, v = proj(wq) * scale, proj(wk) * scale, proj(wv)
    dot = jnp.einsum("bhtk,bhsk->bhts", q, k_)
    p = jax.nn.softmax(dot, axis=-1)
    out = jnp.einsum("bhts,bhsk->bhtk", p, v).transpose(0, 2, 1, 3).reshape(B, T, H * K)
    attended = out @ wu + bu

    def ln(v_, g, b):
        m = jnp.mean(v_, axis=-1, keepdims=True)
        va = jnp.mean((v_ - m) ** 2, axis=-1, keepdims=True)
        return (v_ - m) / jnp.sqrt(va + EPS) * g + b

    x1 = ln(attended + x, g1, be1)
    ff = jnp.maximum(x1 @ w1 + bf1, 0.0) @ w2 + bf2
    return ln(ff + x1, g2, be2)


if __name__ == "__main__":
    key = jax.random.PRNGKey(0)

    # Test 1: small shape matching the module spec (single query/key tile).
    B, T, K, H = 2, 8, 32, 4
    kx, kp, key = jax.random.split(key, 3)
    x = jax.random.normal(kx, (B, T, K), jnp.float32)
    params = make_params(kp, K, H)

    out = jax.block_until_ready(transformer_block(x, params))
    ref = reference_block(x, params)
    assert out.shape == (B, T, K)
    # bf16 MXU operands -> tolerance relaxed relative to an f32-only path.
    assert jnp.allclose(out, ref, atol=2e-2, rtol=2e-2), "mismatch vs reference (test 1)"

    # Test 2: exercises the query-tile AND key-tile grid axes (online softmax
    # accumulated across 4 key tiles, 2 query tiles, 2 batch steps).
    B2, T2, K2, H2 = 2, 256, 128, 2
    kx2, kp2 = jax.random.split(key)
    x2 = jax.random.normal(kx2, (B2, T2, K2), jnp.float32)
    params2 = make_params(kp2, K2, H2)

    out2 = jax.block_until_ready(transformer_block(x2, params2, tq=128, tk=64))
    ref2 = reference_block(x2, params2)
    assert out2.shape == (B2, T2, K2)
    assert jnp.allclose(out2, ref2, atol=2e-2, rtol=2e-2), "mismatch vs reference (test 2)"

    print("KERNEL_OK")
</pallas_src>

<mosaic_0001>
module attributes {stable_mosaic.version = 11 : i64} {
  func.func @transformer_block_kernel(%arg0: i32, %arg1: i32, %arg2: i32, %arg3: memref<1x8x32xf32, #tpu.memory_space<vmem>>, %arg4: memref<1x4x8x32xbf16, #tpu.memory_space<vmem>>, %arg5: memref<1x4x8x32xbf16, #tpu.memory_space<vmem>>, %arg6: memref<1x4x8x32xbf16, #tpu.memory_space<vmem>>, %arg7: memref<4x32x32xbf16, #tpu.memory_space<vmem>>, %arg8: memref<1x32xf32, #tpu.memory_space<vmem>>, %arg9: memref<1x32xf32, #tpu.memory_space<vmem>>, %arg10: memref<1x32xf32, #tpu.memory_space<vmem>>, %arg11: memref<32x128xbf16, #tpu.memory_space<vmem>>, %arg12: memref<1x128xf32, #tpu.memory_space<vmem>>, %arg13: memref<128x32xbf16, #tpu.memory_space<vmem>>, %arg14: memref<1x32xf32, #tpu.memory_space<vmem>>, %arg15: memref<1x32xf32, #tpu.memory_space<vmem>>, %arg16: memref<1x32xf32, #tpu.memory_space<vmem>>, %arg17: memref<1x8x32xf32, #tpu.memory_space<vmem>>, %arg18: memref<4x8x1xf32, #tpu.memory_space<vmem>>, %arg19: memref<4x8x1xf32, #tpu.memory_space<vmem>>, %arg20: memref<4x8x32xf32, #tpu.memory_space<vmem>>) attributes {dimension_semantics = [#tpu.dimension_semantics<parallel>, #tpu.dimension_semantics<parallel>, #tpu.dimension_semantics<arbitrary>], iteration_bounds = array<i64: 2, 1, 1>, scalar_prefetch = 0 : i64, scratch_operands = 3 : i64, tpu.core_type = #tpu.core_type<tc>, window_params = [{transform_indices = @transform_0, window_bounds = array<i64: 1, 8, 32>}, {transform_indices = @transform_1, window_bounds = array<i64: 1, 4, 8, 32>}, {transform_indices = @transform_2, window_bounds = array<i64: 1, 4, 8, 32>}, {transform_indices = @transform_3, window_bounds = array<i64: 1, 4, 8, 32>}, {pipeline_mode = #tpu.pipeline_mode<synchronous>, transform_indices = @transform_4, window_bounds = array<i64: 4, 32, 32>}, {pipeline_mode = #tpu.pipeline_mode<synchronous>, transform_indices = @transform_5, window_bounds = array<i64: 1, 32>}, {pipeline_mode = #tpu.pipeline_mode<synchronous>, transform_indices = @transform_6, window_bounds = array<i64: 1, 32>}, {pipeline_mode = #tpu.pipeline_mode<synchronous>, transform_indices = @transform_7, window_bounds = array<i64: 1, 32>}, {pipeline_mode = #tpu.pipeline_mode<synchronous>, transform_indices = @transform_8, window_bounds = array<i64: 32, 128>}, {pipeline_mode = #tpu.pipeline_mode<synchronous>, transform_indices = @transform_9, window_bounds = array<i64: 1, 128>}, {pipeline_mode = #tpu.pipeline_mode<synchronous>, transform_indices = @transform_10, window_bounds = array<i64: 128, 32>}, {pipeline_mode = #tpu.pipeline_mode<synchronous>, transform_indices = @transform_11, window_bounds = array<i64: 1, 32>}, {pipeline_mode = #tpu.pipeline_mode<synchronous>, transform_indices = @transform_12, window_bounds = array<i64: 1, 32>}, {pipeline_mode = #tpu.pipeline_mode<synchronous>, transform_indices = @transform_13, window_bounds = array<i64: 1, 32>}, {transform_indices = @transform_14, window_bounds = array<i64: 1, 8, 32>}]} {
    %c0_i32 = arith.constant 0 : i32
    %0 = arith.cmpi eq, %arg2, %c0_i32 : i32
    %1 = arith.extui %0 : i1 to i32
    %c0_i32_0 = arith.constant 0 : i32
    %2 = arith.cmpi ne, %1, %c0_i32_0 : i32
    scf.if %2 {
      %cst_35 = arith.constant 0xFF800000 : f32
      %36 = vector.broadcast %cst_35 : f32 to vector<4x8x1xf32>
      %c0_36 = arith.constant 0 : index
      %c0_37 = arith.constant 0 : index
      %c0_38 = arith.constant 0 : index
      %37 = vector.load %arg18[%c0_36, %c0_37, %c0_38] : memref<4x8x1xf32, #tpu.memory_space<vmem>>, vector<4x8x1xf32>
      tpu.vector_store %arg18[%c0_36, %c0_37, %c0_38], %36 {strides = array<i32>} : memref<4x8x1xf32, #tpu.memory_space<vmem>>, vector<4x8x1xf32>,
      %cst_39 = arith.constant 0.000000e+00 : f32
      %38 = vector.broadcast %cst_39 : f32 to vector<4x8x1xf32>
      %c0_40 = arith.constant 0 : index
      %c0_41 = arith.constant 0 : index
      %c0_42 = arith.constant 0 : index
      %39 = vector.load %arg19[%c0_40, %c0_41, %c0_42] : memref<4x8x1xf32, #tpu.memory_space<vmem>>, vector<4x8x1xf32>
      tpu.vector_store %arg19[%c0_40, %c0_41, %c0_42], %38 {strides = array<i32>} : memref<4x8x1xf32, #tpu.memory_space<vmem>>, vector<4x8x1xf32>,
      %cst_43 = arith.constant 0.000000e+00 : f32
      %40 = vector.broadcast %cst_43 : f32 to vector<4x8x32xf32>
      %c0_44 = arith.constant 0 : index
      %c0_45 = arith.constant 0 : index
      %c0_46 = arith.constant 0 : index
      %41 = vector.load %arg20[%c0_44, %c0_45, %c0_46] : memref<4x8x32xf32, #tpu.memory_space<vmem>>, vector<4x8x32xf32>
      tpu.vector_store %arg20[%c0_44, %c0_45, %c0_46], %40 {strides = array<i32>} : memref<4x8x32xf32, #tpu.memory_space<vmem>>, vector<4x8x32xf32>,
    } else {
    }
    %c0 = arith.constant 0 : index
    %c0_1 = arith.constant 0 : index
    %c0_2 = arith.constant 0 : index
    %c0_3 = arith.constant 0 : index
    %3 = vector.load %arg4[%c0, %c0_1, %c0_2, %c0_3] : memref<1x4x8x32xbf16, #tpu.memory_space<vmem>>, vector<1x4x8x32xbf16>
    %4 = vector.shape_cast %3 : vector<1x4x8x32xbf16> to vector<4x8x32xbf16>
    %c0_4 = arith.constant 0 : index
    %c0_5 = arith.constant 0 : index
    %c0_6 = arith.constant 0 : index
    %c0_7 = arith.constant 0 : index
    %5 = vector.load %arg5[%c0_4, %c0_5, %c0_6, %c0_7] : memref<1x4x8x32xbf16, #tpu.memory_space<vmem>>, vector<1x4x8x32xbf16>
    %6 = vector.shape_cast %5 : vector<1x4x8x32xbf16> to vector<4x8x32xbf16>
    "tpu.trace_start"() <{level = 10 : i32, message = "hqd,hkd->hqk"}> : () -> ()
    %cst = arith.constant dense<0.000000e+00> : vector<4x8x8xf32>
    %7 = tpu.matmul %4, %6, %cst {dimension_numbers = #tpu.dot_dimension_numbers<[2], [2], [1], [1], [0, 0, 0, 1, 1, 1], [0], [0]>} : vector<4x8x32xbf16>, vector<4x8x32xbf16>, vector<4x8x8xf32> -> vector<4x8x8xf32>
    "tpu.trace_stop"() : () -> ()
    %c0_8 = arith.constant 0 : index
    %c0_9 = arith.constant 0 : index
    %c0_10 = arith.constant 0 : index
    %8 = vector.load %arg18[%c0_8, %c0_9, %c0_10] : memref<4x8x1xf32, #tpu.memory_space<vmem>>, vector<4x8x1xf32>
    %cst_11 = arith.constant dense<0xFF800000> : vector<4x8xf32>
    %9 = vector.multi_reduction <maximumf>, %7, %cst_11 [2] : vector<4x8x8xf32> to vector<4x8xf32>
    %10 = vector.shape_cast %9 : vector<4x8xf32> to vector<4x8x1xf32>
    %11 = arith.maximumf %8, %10 : vector<4x8x1xf32>
    %12 = arith.subf %8, %11 : vector<4x8x1xf32>
    %13 = math.exp %12 : vector<4x8x1xf32>
    %14 = vector.broadcast %11 : vector<4x8x1xf32> to vector<4x8x8xf32>
    %15 = arith.subf %7, %14 : vector<4x8x8xf32>
    %16 = math.exp %15 : vector<4x8x8xf32>
    %c0_12 = arith.constant 0 : index
    %c0_13 = arith.constant 0 : index
    %c0_14 = arith.constant 0 : index
    %17 = vector.load %arg19[%c0_12, %c0_13, %c0_14] : memref<4x8x1xf32, #tpu.memory_space<vmem>>, vector<4x8x1xf32>
    %18 = arith.mulf %13, %17 : vector<4x8x1xf32>
    %cst_15 = arith.constant dense<0.000000e+00> : vector<4x8xf32>
    %19 = vector.multi_reduction <add>, %16, %cst_15 [2] : vector<4x8x8xf32> to vector<4x8xf32>
    %20 = vector.shape_cast %19 : vector<4x8xf32> to vector<4x8x1xf32>
    %21 = arith.addf %18, %20 : vector<4x8x1xf32>
    %c0_16 = arith.constant 0 : index
    %c0_17 = arith.constant 0 : index
    %c0_18 = arith.constant 0 : index
    %22 = vector.load %arg19[%c0_16, %c0_17, %c0_18] : memref<4x8x1xf32, #tpu.memory_space<vmem>>, vector<4x8x1xf32>
    tpu.vector_store %arg19[%c0_16, %c0_17, %c0_18], %21 {strides = array<i32>} : memref<4x8x1xf32, #tpu.memory_space<vmem>>, vector<4x8x1xf32>,
    %c0_19 = arith.constant 0 : index
    %c0_20 = arith.constant 0 : index
    %c0_21 = arith.constant 0 : index
    %23 = vector.load %arg20[%c0_19, %c0_20, %c0_21] : memref<4x8x32xf32, #tpu.memory_space<vmem>>, vector<4x8x32xf32>
    %24 = vector.broadcast %13 : vector<4x8x1xf32> to vector<4x8x32xf32>
    %25 = arith.mulf %24, %23 : vector<4x8x32xf32>
    %26 = arith.truncf %16 : vector<4x8x8xf32> to vector<4x8x8xbf16>
    %c0_22 = arith.constant 0 : index
    %c0_23 = arith.constant 0 : index
    %c0_24 = arith.constant 0 : index
    %c0_25 = arith.constant 0 : index
    %27 = vector.load %arg6[%c0_22, %c0_23, %c0_24, %c0_25] : memref<1x4x8x32xbf16, #tpu.memory_space<vmem>>, vector<1x4x8x32xbf16>
    %28 = vector.shape_cast %27 : vector<1x4x8x32xbf16> to vector<4x8x32xbf16>
    "tpu.trace_start"() <{level = 10 : i32, message = "hqk,hkd->hqd"}> : () -> ()
    %cst_26 = arith.constant dense<0.000000e+00> : vector<4x8x32xf32>
    %29 = tpu.matmul %26, %28, %cst_26 {dimension_numbers = #tpu.dot_dimension_numbers<[2], [1], [1], [2], [0, 0, 0, 1, 1, 2], [0], [0]>} : vector<4x8x8xbf16>, vector<4x8x32xbf16>, vector<4x8x32xf32> -> vector<4x8x32xf32>
    "tpu.trace_stop"() : () -> ()
    %30 = arith.addf %25, %29 : vector<4x8x32xf32>
    %c0_27 = arith.constant 0 : index
    %c0_28 = arith.constant 0 : index
    %c0_29 = arith.constant 0 : index
    %31 = vector.load %arg20[%c0_27, %c0_28, %c0_29] : memref<4x8x32xf32, #tpu.memory_space<vmem>>, vector<4x8x32xf32>
    tpu.vector_store %arg20[%c0_27, %c0_28, %c0_29], %30 {strides = array<i32>} : memref<4x8x32xf32, #tpu.memory_space<vmem>>, vector<4x8x32xf32>,
    %c0_30 = arith.constant 0 : index
    %c0_31 = arith.constant 0 : index
    %c0_32 = arith.constant 0 : index
    %32 = vector.load %arg18[%c0_30, %c0_31, %c0_32] : memref<4x8x1xf32, #tpu.memory_space<vmem>>, vector<4x8x1xf32>
    tpu.vector_store %arg18[%c0_30, %c0_31, %c0_32], %11 {strides = array<i32>} : memref<4x8x1xf32, #tpu.memory_space<vmem>>, vector<4x8x1xf32>,
    %c0_i32_33 = arith.constant 0 : i32
    %33 = arith.cmpi eq, %arg2, %c0_i32_33 : i32
    %34 = arith.extui %33 : i1 to i32
    %c0_i32_34 = arith.constant 0 : i32
    %35 = arith.cmpi ne, %34, %c0_i32_34 : i32
    scf.if %35 {
      %c0_35 = arith.constant 0 : index
      %c0_36 = arith.constant 0 : index
      %c0_37 = arith.constant 0 : index
      %36 = vector.load %arg19[%c0_35, %c0_36, %c0_37] : memref<4x8x1xf32, #tpu.memory_space<vmem>>, vector<4x8x1xf32>
      %37 = tpu.reciprocal %36 {approx = true} : vector<4x8x1xf32> -> vector<4x8x1xf32>
      %c0_38 = arith.constant 0 : index
      %c0_39 = arith.constant 0 : index
      %c0_40 = arith.constant 0 : index
      %38 = vector.load %arg20[%c0_38, %c0_39, %c0_40] : memref<4x8x32xf32, #tpu.memory_space<vmem>>, vector<4x8x32xf32>
      %39 = vector.broadcast %37 : vector<4x8x1xf32> to vector<4x8x32xf32>
      %40 = arith.mulf %38, %39 : vector<4x8x32xf32>
      %41 = arith.truncf %40 : vector<4x8x32xf32> to vector<4x8x32xbf16>
      %42 = vector.extract_strided_slice %41 {offsets = [0, 0, 0], sizes = [1, 8, 32], strides = [1, 1, 1]} : vector<4x8x32xbf16> to vector<1x8x32xbf16>
      %43 = vector.shape_cast %42 : vector<1x8x32xbf16> to vector<8x32xbf16>
      %c0_41 = arith.constant 0 : index
      %c0_42 = arith.constant 0 : index
      %c0_43 = arith.constant 0 : index
      %44 = vector.load %arg7[%c0_41, %c0_42, %c0_43] : memref<4x32x32xbf16, #tpu.memory_space<vmem>>, vector<1x32x32xbf16>
      %45 = vector.shape_cast %44 : vector<1x32x32xbf16> to vector<32x32xbf16>
      %cst_44 = arith.constant dense<0.000000e+00> : vector<8x32xf32>
      %46 = tpu.matmul %43, %45, %cst_44 {dimension_numbers = #tpu.dot_dimension_numbers<[1], [0], [0], [1], [0, 0, 1, 1], [], []>} : vector<8x32xbf16>, vector<32x32xbf16>, vector<8x32xf32> -> vector<8x32xf32>
      %47 = vector.extract_strided_slice %41 {offsets = [1, 0, 0], sizes = [1, 8, 32], strides = [1, 1, 1]} : vector<4x8x32xbf16> to vector<1x8x32xbf16>
      %48 = vector.shape_cast %47 : vector<1x8x32xbf16> to vector<8x32xbf16>
      %c1 = arith.constant 1 : index
      %c0_45 = arith.constant 0 : index
      %c0_46 = arith.constant 0 : index
      %49 = vector.load %arg7[%c1, %c0_45, %c0_46] : memref<4x32x32xbf16, #tpu.memory_space<vmem>>, vector<1x32x32xbf16>
      %50 = vector.shape_cast %49 : vector<1x32x32xbf16> to vector<32x32xbf16>
      %cst_47 = arith.constant dense<0.000000e+00> : vector<8x32xf32>
      %51 = tpu.matmul %48, %50, %cst_47 {dimension_numbers = #tpu.dot_dimension_numbers<[1], [0], [0], [1], [0, 0, 1, 1], [], []>} : vector<8x32xbf16>, vector<32x32xbf16>, vector<8x32xf32> -> vector<8x32xf32>
      %52 = arith.addf %46, %51 : vector<8x32xf32>
      %53 = vector.extract_strided_slice %41 {offsets = [2, 0, 0], sizes = [1, 8, 32], strides = [1, 1, 1]} : vector<4x8x32xbf16> to vector<1x8x32xbf16>
      %54 = vector.shape_cast %53 : vector<1x8x32xbf16> to vector<8x32xbf16>
      %c2 = arith.constant 2 : index
      %c0_48 = arith.constant 0 : index
      %c0_49 = arith.constant 0 : index
      %55 = vector.load %arg7[%c2, %c0_48, %c0_49] : memref<4x32x32xbf16, #tpu.memory_space<vmem>>, vector<1x32x32xbf16>
      %56 = vector.shape_cast %55 : vector<1x32x32xbf16> to vector<32x32xbf16>
      %cst_50 = arith.constant dense<0.000000e+00> : vector<8x32xf32>
      %57 = tpu.matmul %54, %56, %cst_50 {dimension_numbers = #tpu.dot_dimension_numbers<[1], [0], [0], [1], [0, 0, 1, 1], [], []>} : vector<8x32xbf16>, vector<32x32xbf16>, vector<8x32xf32> -> vector<8x32xf32>
      %58 = arith.addf %52, %57 : vector<8x32xf32>
      %59 = vector.extract_strided_slice %41 {offsets = [3, 0, 0], sizes = [1, 8, 32], strides = [1, 1, 1]} : vector<4x8x32xbf16> to vector<1x8x32xbf16>
      %60 = vector.shape_cast %59 : vector<1x8x32xbf16> to vector<8x32xbf16>
      %c3 = arith.constant 3 : index
      %c0_51 = arith.constant 0 : index
      %c0_52 = arith.constant 0 : index
      %61 = vector.load %arg7[%c3, %c0_51, %c0_52] : memref<4x32x32xbf16, #tpu.memory_space<vmem>>, vector<1x32x32xbf16>
      %62 = vector.shape_cast %61 : vector<1x32x32xbf16> to vector<32x32xbf16>
      %cst_53 = arith.constant dense<0.000000e+00> : vector<8x32xf32>
      %63 = tpu.matmul %60, %62, %cst_53 {dimension_numbers = #tpu.dot_dimension_numbers<[1], [0], [0], [1], [0, 0, 1, 1], [], []>} : vector<8x32xbf16>, vector<32x32xbf16>, vector<8x32xf32> -> vector<8x32xf32>
      %64 = arith.addf %58, %63 : vector<8x32xf32>
      %c0_54 = arith.constant 0 : index
      %c0_55 = arith.constant 0 : index
      %65 = vector.load %arg8[%c0_54, %c0_55] : memref<1x32xf32, #tpu.memory_space<vmem>>, vector<1x32xf32>
      %66 = vector.broadcast %65 : vector<1x32xf32> to vector<8x32xf32>
      %67 = arith.addf %64, %66 : vector<8x32xf32>
      %c0_56 = arith.constant 0 : index
      %c0_57 = arith.constant 0 : index
      %c0_58 = arith.constant 0 : index
      %68 = vector.load %arg3[%c0_56, %c0_57, %c0_58] : memref<1x8x32xf32, #tpu.memory_space<vmem>>, vector<1x8x32xf32>
      %69 = vector.shape_cast %68 : vector<1x8x32xf32> to vector<8x32xf32>
      %70 = arith.addf %67, %69 : vector<8x32xf32>
      %c0_59 = arith.constant 0 : index
      %c0_60 = arith.constant 0 : index
      %71 = vector.load %arg9[%c0_59, %c0_60] : memref<1x32xf32, #tpu.memory_space<vmem>>, vector<1x32xf32>
      %c0_61 = arith.constant 0 : index
      %c0_62 = arith.constant 0 : index
      %72 = vector.load %arg10[%c0_61, %c0_62] : memref<1x32xf32, #tpu.memory_space<vmem>>, vector<1x32xf32>
      %cst_63 = arith.constant dense<0.000000e+00> : vector<8xf32>
      %73 = vector.multi_reduction <add>, %70, %cst_63 [1] : vector<8x32xf32> to vector<8xf32>
      %74 = vector.shape_cast %73 : vector<8xf32> to vector<8x1xf32>
      %cst_64 = arith.constant 3.200000e+01 : f32
      %75 = vector.broadcast %cst_64 : f32 to vector<8x1xf32>
      %76 = arith.divf %74, %75 : vector<8x1xf32>
      %77 = vector.broadcast %76 : vector<8x1xf32> to vector<8x32xf32>
      %78 = arith.subf %70, %77 : vector<8x32xf32>
      %79 = arith.mulf %78, %78 : vector<8x32xf32>
      %cst_65 = arith.constant dense<0.000000e+00> : vector<8xf32>
      %80 = vector.multi_reduction <add>, %79, %cst_65 [1] : vector<8x32xf32> to vector<8xf32>
      %81 = vector.shape_cast %80 : vector<8xf32> to vector<8x1xf32>
      %cst_66 = arith.constant 3.200000e+01 : f32
      %82 = vector.broadcast %cst_66 : f32 to vector<8x1xf32>
      %83 = arith.divf %81, %82 : vector<8x1xf32>
      %84 = vector.broadcast %76 : vector<8x1xf32> to vector<8x32xf32>
      %85 = arith.subf %70, %84 : vector<8x32xf32>
      %cst_67 = arith.constant 9.99999974E-6 : f32
      %86 = vector.broadcast %cst_67 : f32 to vector<8x1xf32>
      %87 = arith.addf %83, %86 : vector<8x1xf32>
      %88 = math.rsqrt %87 : vector<8x1xf32>
      %89 = vector.broadcast %88 : vector<8x1xf32> to vector<8x32xf32>
      %90 = arith.mulf %85, %89 : vector<8x32xf32>
      %91 = vector.broadcast %71 : vector<1x32xf32> to vector<8x32xf32>
      %92 = arith.mulf %90, %91 : vector<8x32xf32>
      %93 = vector.broadcast %72 : vector<1x32xf32> to vector<8x32xf32>
      %94 = arith.addf %92, %93 : vector<8x32xf32>
      %95 = arith.truncf %94 : vector<8x32xf32> to vector<8x32xbf16>
      %c0_68 = arith.constant 0 : index
      %c0_69 = arith.constant 0 : index
      %96 = vector.load %arg11[%c0_68, %c0_69] : memref<32x128xbf16, #tpu.memory_space<vmem>>, vector<32x128xbf16>
      %cst_70 = arith.constant dense<0.000000e+00> : vector<8x128xf32>
      %97 = tpu.matmul %95, %96, %cst_70 {dimension_numbers = #tpu.dot_dimension_numbers<[1], [0], [0], [1], [0, 0, 1, 1], [], []>} : vector<8x32xbf16>, vector<32x128xbf16>, vector<8x128xf32> -> vector<8x128xf32>
      %c0_71 = arith.constant 0 : index
      %c0_72 = arith.constant 0 : index
      %98 = vector.load %arg12[%c0_71, %c0_72] : memref<1x128xf32, #tpu.memory_space<vmem>>, vector<1x128xf32>
      %99 = vector.broadcast %98 : vector<1x128xf32> to vector<8x128xf32>
      %100 = arith.addf %97, %99 : vector<8x128xf32>
      %cst_73 = arith.constant 0.000000e+00 : f32
      %101 = vector.broadcast %cst_73 : f32 to vector<8x128xf32>
      %102 = arith.maximumf %100, %101 : vector<8x128xf32>
      %103 = arith.truncf %102 : vector<8x128xf32> to vector<8x128xbf16>
      %c0_74 = arith.constant 0 : index
      %c0_75 = arith.constant 0 : index
      %104 = vector.load %arg13[%c0_74, %c0_75] : memref<128x32xbf16, #tpu.memory_space<vmem>>, vector<128x32xbf16>
      %cst_76 = arith.constant dense<0.000000e+00> : vector<8x32xf32>
      %105 = tpu.matmul %103, %104, %cst_76 {dimension_numbers = #tpu.dot_dimension_numbers<[1], [0], [0], [1], [0, 0, 1, 1], [], []>} : vector<8x128xbf16>, vector<128x32xbf16>, vector<8x32xf32> -> vector<8x32xf32>
      %c0_77 = arith.constant 0 : index
      %c0_78 = arith.constant 0 : index
      %106 = vector.load %arg14[%c0_77, %c0_78] : memref<1x32xf32, #tpu.memory_space<vmem>>, vector<1x32xf32>
      %107 = vector.broadcast %106 : vector<1x32xf32> to vector<8x32xf32>
      %108 = arith.addf %105, %107 : vector<8x32xf32>
      %109 = arith.addf %108, %94 : vector<8x32xf32>
      %c0_79 = arith.constant 0 : index
      %c0_80 = arith.constant 0 : index
      %110 = vector.load %arg15[%c0_79, %c0_80] : memref<1x32xf32, #tpu.memory_space<vmem>>, vector<1x32xf32>
      %c0_81 = arith.constant 0 : index
      %c0_82 = arith.constant 0 : index
      %111 = vector.load %arg16[%c0_81, %c0_82] : memref<1x32xf32, #tpu.memory_space<vmem>>, vector<1x32xf32>
      %cst_83 = arith.constant dense<0.000000e+00> : vector<8xf32>
      %112 = vector.multi_reduction <add>, %109, %cst_83 [1] : vector<8x32xf32> to vector<8xf32>
      %113 = vector.shape_cast %112 : vector<8xf32> to vector<8x1xf32>
      %cst_84 = arith.constant 3.200000e+01 : f32
      %114 = vector.broadcast %cst_84 : f32 to vector<8x1xf32>
      %115 = arith.divf %113, %114 : vector<8x1xf32>
      %116 = vector.broadcast %115 : vector<8x1xf32> to vector<8x32xf32>
      %117 = arith.subf %109, %116 : vector<8x32xf32>
      %118 = arith.mulf %117, %117 : vector<8x32xf32>
      %cst_85 = arith.constant dense<0.000000e+00> : vector<8xf32>
      %119 = vector.multi_reduction <add>, %118, %cst_85 [1] : vector<8x32xf32> to vector<8xf32>
      %120 = vector.shape_cast %119 : vector<8xf32> to vector<8x1xf32>
      %cst_86 = arith.constant 3.200000e+01 : f32
      %121 = vector.broadcast %cst_86 : f32 to vector<8x1xf32>
      %122 = arith.divf %120, %121 : vector<8x1xf32>
      %123 = vector.broadcast %115 : vector<8x1xf32> to vector<8x32xf32>
      %124 = arith.subf %109, %123 : vector<8x32xf32>
      %cst_87 = arith.constant 9.99999974E-6 : f32
      %125 = vector.broadcast %cst_87 : f32 to vector<8x1xf32>
      %126 = arith.addf %122, %125 : vector<8x1xf32>
      %127 = math.rsqrt %126 : vector<8x1xf32>
      %128 = vector.broadcast %127 : vector<8x1xf32> to vector<8x32xf32>
      %129 = arith.mulf %124, %128 : vector<8x32xf32>
      %130 = vector.broadcast %110 : vector<1x32xf32> to vector<8x32xf32>
      %131 = arith.mulf %129, %130 : vector<8x32xf32>
      %132 = vector.broadcast %111 : vector<1x32xf32> to vector<8x32xf32>
      %133 = arith.addf %131, %132 : vector<8x32xf32>
      %c0_88 = arith.constant 0 : index
      %c0_89 = arith.constant 0 : index
      %c0_90 = arith.constant 0 : index
      %134 = vector.load %arg17[%c0_88, %c0_89, %c0_90] : memref<1x8x32xf32, #tpu.memory_space<vmem>>, vector<1x8x32xf32>
      %135 = vector.shape_cast %134 : vector<1x8x32xf32> to vector<8x32xf32>
      %136 = vector.shape_cast %133 : vector<8x32xf32> to vector<1x8x32xf32>
      tpu.vector_store %arg17[%c0_88, %c0_89, %c0_90], %136 {strides = array<i32>} : memref<1x8x32xf32, #tpu.memory_space<vmem>>, vector<1x8x32xf32>,
    } else {
    }
    return
  }
  func.func @transform_0(%arg0: i32, %arg1: i32, %arg2: i32) -> (i32, i32, i32) {
    %c0_i32 = arith.constant 0 : i32
    %c0_i32_0 = arith.constant 0 : i32
    return %arg0, %arg1, %c0_i32 : i32, i32, i32
  }
  func.func @transform_1(%arg0: i32, %arg1: i32, %arg2: i32) -> (i32, i32, i32, i32) {
    %c0_i32 = arith.constant 0 : i32
    %c0_i32_0 = arith.constant 0 : i32
    %c0_i32_1 = arith.constant 0 : i32
    return %arg0, %c0_i32, %arg1, %c0_i32_0 : i32, i32, i32, i32
  }
  func.func @transform_2(%arg0: i32, %arg1: i32, %arg2: i32) -> (i32, i32, i32, i32) {
    %c0_i32 = arith.constant 0 : i32
    %c0_i32_0 = arith.constant 0 : i32
    %c0_i32_1 = arith.constant 0 : i32
    return %arg0, %c0_i32, %arg2, %c0_i32_0 : i32, i32, i32, i32
  }
  func.func @transform_3(%arg0: i32, %arg1: i32, %arg2: i32) -> (i32, i32, i32, i32) {
    %c0_i32 = arith.constant 0 : i32
    %c0_i32_0 = arith.constant 0 : i32
    %c0_i32_1 = arith.constant 0 : i32
    return %arg0, %c0_i32, %arg2, %c0_i32_0 : i32, i32, i32, i32
  }
  func.func @transform_4(%arg0: i32, %arg1: i32, %arg2: i32) -> (i32, i32, i32) {
    %c0_i32 = arith.constant 0 : i32
    %c0_i32_0 = arith.constant 0 : i32
    %c0_i32_1 = arith.constant 0 : i32
    %c0_i32_2 = arith.constant 0 : i32
    return %c0_i32, %c0_i32_0, %c0_i32_1 : i32, i32, i32
  }
  func.func @transform_5(%arg0: i32, %arg1: i32, %arg2: i32) -> (i32, i32) {
    %c0_i32 = arith.constant 0 : i32
    %c0_i32_0 = arith.constant 0 : i32
    %c0_i32_1 = arith.constant 0 : i32
    return %c0_i32, %c0_i32_0 : i32, i32
  }
  func.func @transform_6(%arg0: i32, %arg1: i32, %arg2: i32) -> (i32, i32) {
    %c0_i32 = arith.constant 0 : i32
    %c0_i32_0 = arith.constant 0 : i32
    %c0_i32_1 = arith.constant 0 : i32
    return %c0_i32, %c0_i32_0 : i32, i32
  }
  func.func @transform_7(%arg0: i32, %arg1: i32, %arg2: i32) -> (i32, i32) {
    %c0_i32 = arith.constant 0 : i32
    %c0_i32_0 = arith.constant 0 : i32
    %c0_i32_1 = arith.constant 0 : i32
    return %c0_i32, %c0_i32_0 : i32, i32
  }
  func.func @transform_8(%arg0: i32, %arg1: i32, %arg2: i32) -> (i32, i32) {
    %c0_i32 = arith.constant 0 : i32
    %c0_i32_0 = arith.constant 0 : i32
    %c0_i32_1 = arith.constant 0 : i32
    return %c0_i32, %c0_i32_0 : i32, i32
  }
  func.func @transform_9(%arg0: i32, %arg1: i32, %arg2: i32) -> (i32, i32) {
    %c0_i32 = arith.constant 0 : i32
    %c0_i32_0 = arith.constant 0 : i32
    %c0_i32_1 = arith.constant 0 : i32
    return %c0_i32, %c0_i32_0 : i32, i32
  }
  func.func @transform_10(%arg0: i32, %arg1: i32, %arg2: i32) -> (i32, i32) {
    %c0_i32 = arith.constant 0 : i32
    %c0_i32_0 = arith.constant 0 : i32
    %c0_i32_1 = arith.constant 0 : i32
    return %c0_i32, %c0_i32_0 : i32, i32
  }
  func.func @transform_11(%arg0: i32, %arg1: i32, %arg2: i32) -> (i32, i32) {
    %c0_i32 = arith.constant 0 : i32
    %c0_i32_0 = arith.constant 0 : i32
    %c0_i32_1 = arith.constant 0 : i32
    return %c0_i32, %c0_i32_0 : i32, i32
  }
  func.func @transform_12(%arg0: i32, %arg1: i32, %arg2: i32) -> (i32, i32) {
    %c0_i32 = arith.constant 0 : i32
    %c0_i32_0 = arith.constant 0 : i32
    %c0_i32_1 = arith.constant 0 : i32
    return %c0_i32, %c0_i32_0 : i32, i32
  }
  func.func @transform_13(%arg0: i32, %arg1: i32, %arg2: i32) -> (i32, i32) {
    %c0_i32 = arith.constant 0 : i32
    %c0_i32_0 = arith.constant 0 : i32
    %c0_i32_1 = arith.constant 0 : i32
    return %c0_i32, %c0_i32_0 : i32, i32
  }
  func.func @transform_14(%arg0: i32, %arg1: i32, %arg2: i32) -> (i32, i32, i32) {
    %c0_i32 = arith.constant 0 : i32
    %c0_i32_0 = arith.constant 0 : i32
    return %arg0, %arg1, %c0_i32 : i32, i32, i32
  }
}

</mosaic_0001>

<bundles_post_ra>
// kernel: tpu_custom_call.1
= control target key start
LH: loop header
LB: loop body
LE: loop exit
PB: predicated region body
PF: predicated region fallthrough
CT: control target
= control target key end

     0   :  { %s3102_s0 = inlined_call_operand.vmem [shape: f32[2,8,32], index: 0, kind: input, shape index: {}]   ;;  %s3103_s1 = inlined_call_operand.hbm [shape: bf16[2,4,8,32], index: 1, kind: input, shape index: {}]   ;;  %s3104_s2 = inlined_call_operand.hbm [shape: bf16[2,4,8,32], index: 2, kind: input, shape index: {}]   ;;  %s3105_s3 = inlined_call_operand.hbm [shape: bf16[2,4,8,32], index: 3, kind: input, shape index: {}]   ;;  %s3106_s4 = inlined_call_operand.vmem [shape: bf16[4,32,32], index: 4, kind: input, shape index: {}]   ;;  %s3107_s5 = inlined_call_operand.vmem [shape: f32[1,32], index: 5, kind: input, shape index: {}]   ;;  %s3108_s6 = inlined_call_operand.vmem [shape: f32[1,32], index: 6, kind: input, shape index: {}]   ;;  %s3109_s7 = inlined_call_operand.vmem [shape: f32[1,32], index: 7, kind: input, shape index: {}]   ;;  %s3110_s8 = inlined_call_operand.hbm [shape: bf16[32,128], index: 8, kind: input, shape index: {}]   ;;  %s3111_s9 = inlined_call_operand.vmem [shape: f32[1,128], index: 9, kind: input, shape index: {}]   ;;  %s3112_s10 = inlined_call_operand.vmem [shape: bf16[128,32], index: 10, kind: input, shape index: {}]   ;;  %s3113_s11 = inlined_call_operand.vmem [shape: f32[1,32], index: 11, kind: input, shape index: {}]   ;;  %s3114_s12 = inlined_call_operand.vmem [shape: f32[1,32], index: 12, kind: input, shape index: {}]   ;;  %s3115_s13 = inlined_call_operand.vmem [shape: f32[1,32], index: 13, kind: input, shape index: {}]   ;;  %s3116_s14 = inlined_call_operand.hbm [shape: f32[2,8,32], index: 14, kind: output, shape index: {}]  }
   0x1   :  { %3141 = sst [smem:[#allocation26_spill]] %s3103_s1 }
   0x2   :  { %3142 = sst [smem:[#allocation27_spill]] %s3104_s2 }
   0x3   :  { %3143 = sst [smem:[#allocation28_spill]] %s3109_s7 }
   0x4   :  { %3144 = sst [smem:[#allocation29_spill]] %s3111_s9 }
   0x5   :  { %3145 = sst [smem:[#allocation30_spill]] %s3113_s11 }
   0x6   :  { %3146 = sst [smem:[#allocation31_spill]] %s3114_s12 }
   0x7   :  { %3147 = sst [smem:[#allocation32_spill]] %s3115_s13 }
   0x8   :  { %3148 = sst [smem:[#allocation33_spill]] %s3116_s14 }
   0x9   :  { %19 = vsyncpa [#allocation6], 0 }
   0xa   :  { %21 = vsyncpa [#allocation6 + $0x1], 0 }
   0xb   :  { %22 = vsyncpa [#allocation9], 0 }
   0xc   :  { %24 = vsyncpa [#allocation9 + $0x1], 0 }
   0xd   :  { %25 = vsyncpa [#allocation12], 0 }
   0xe   :  { %26 = vsyncpa [#allocation7], 0 }
   0xf   :  { %28 = vsyncpa [#allocation7 + $0x1], 0  ;;  %s2540_s29 = smov 0   ;;  %s2542_s30 = smov 0  }
  0x10   :  { %s2544_s15 = smov 0   ;;  %s2546_s16 = smov 0  }
  0x11   :  { %s2548_s17 = smov 0   ;;  %s2550_s18 = smov 0  }
  0x12 LB: > { %3149 = sst [smem:[#allocation18_spill]] %s2432_s29  ;;  %s53_s19 = sadd.s32 1, %s2448_s17  ;;  %s2452_s18 = sphi %s2550_s18, %s34_s18   ;;  %s2448_s17 = sphi %s2548_s17, %s3193_s17   ;;  %s2444_s16 = sphi %s2546_s16, %s3192_s16   ;;  %s2440_s15 = sphi %s2544_s15, %s3191_s15   ;;  %s2436_s30 = sphi %s2542_s30, %s3195_s30   ;;  %s2432_s29 = sphi %s2540_s29, %s3194_s29  }
  0x13   : > { %3150 = sst [smem:[#allocation19_spill]] %s2440_s15  ;;  %s90_s20 = sadd.s32 1, %s2440_s15 }
  0x14   : > { %3151 = sst [smem:[#allocation20_spill]] %s2448_s17  ;;  %p55_p0 = scmp.ge.s32.totalorder %s53_s19, 2 }
  0x15   : > { %3152 = sst [smem:[#allocation21_spill]] %s2452_s18  ;;  %p3121_p1 = scmp.ne.s32.totalorder %s2440_s15, %s2436_s30 }
  0x16   : > { %p98_p2 = scmp.eq.s32.totalorder %s2452_s18, 0  ;;  %s3197_s19 = smov (%p55_p0, %s53_s19), 0 }
  0x17   : > { %3153 = sst [smem:[#allocation22_spill]] %s3197_s19  ;;  %s85_s21 = ssub.s32 %s2448_s17, %s3197_s19 }
  0x18   : > { %p99_p3 = por %p98_p2, %p3121_p1  ;;  %p88_p5 = scmp.eq.s32.totalorder %s85_s21, 0 }
  0x19   : > { %p2138_p6 = scmp.lt.s32.totalorder %s2452_s18, 2  ;;  %s3119_s22 = sand.u32 1, %s2440_s15  }
  0x1a   : > { %s2586_s23 = sshll.u32 %s2448_s17, 8  ;;  %s2593_s25 = sshll.u32 %s3119_s22, 4 }
  0x1b   : > { %s2589_s24 = scalar_select %p88_p5, %s2440_s15, %s90_s20  }
  0x1c   : > { %p2595_p7 = pnand %p2138_p6, %p99_p3  ;;  %s493_s27 = sand.u32 1, %s2452_s18  }
  0x1d   : > { %3154 = sst [smem:[#allocation23_spill]] %s2589_s24  ;;  %s3156_s2 = sld [smem:[#allocation27_spill]] }
  0x1e   : > { %s3155_s26 = scalar_select %p2595_p7, 1, 0 }
  0x1f   : > { %s497_s20 = scalar_lea.vmem [#allocation8], %s2593_s25  ;;  %s2609_s22 = scalar_lea.sflag [#allocation9], %s493_s27 }
  0x20   : > { %s505_s17 = sshll.u32 %s497_s20, 4  ;;  %p2615_p9 = pneg %p2595_p7  ;;  %s2607_s17 = int_to_ptr.vmem [resolvable:$true] %s505_s17 }
  0x22   : > { %s3157_s14 = scalar_select %p2615_p9, 1, 0 }
  0x23   : > { %s2604_s21 = scalar_lea.hbm %s3156_s2, %s2586_s23  ;;  %s2249_s13 = scalar_lea.hbm %s3156_s2, 512 }
  0x24   : > { %s2244_s24 = scalar_lea.hbm %s2604_s21, 256  ;;  %p2250_p12 = scmp.lt.u32.totalorder %s2604_s21, %s3156_s2 }
  0x25   : > { %p2245_p8 = scmp.ne.s32.totalorder %s2604_s21, %s2244_s24  ;;  %p2251_p13 = scmp.lt.u32.totalorder %s2249_s13, %s2244_s24 }
  0x26   : > { %p2253_p2 = scmp.lt.u32.totalorder %s2244_s24, %s2604_s21 }
  0x27   : > { %p2247_p10 = pnand %p2615_p9, %p2245_p8  ;;  %p2252_p0 = por %p2251_p13, %p2250_p12 }
  0x29   : > { %p2248_p11 = pneg %p2247_p10  ;;  %p2254_p3 = por %p2253_p2, %p2252_p0 }
  0x2b   : > { %p2255_p5 = pnand %p2254_p3, %p2248_p11 }
  0x2d   : > { %2258 = shalt.err (!%p2255_p5)
}
  0x2e   : > { %s2259_s27 = scalar_lea.vmem %s2607_s17, 256  ;;  %s2454_s19 = smov [#allocation8]  }
  0x2f   : > { %p2260_p6 = scmp.ne.s32.totalorder %s2607_s17, %s2259_s27  ;;  %s2264_s28 = sshll.u32 %s2454_s19, 4  ;;  %s2265_s28 = int_to_ptr.vmem [resolvable:$false] %s2264_s28 }
  0x30   : > { %s2266_s12 = scalar_lea.vmem %s2265_s28, 512  ;;  %p2267_p4 = scmp.lt.s32.totalorder %s2607_s17, %s2265_s28 }
  0x31   : > { %p2262_p8 = pnand %p2260_p6, %p2615_p9  ;;  %p2268_p1 = scmp.lt.s32.totalorder %s2266_s12, %s2259_s27 }
  0x33   : > { %p2263_p10 = pneg %p2262_p8  ;;  %p2269_p12 = por %p2268_p1, %p2267_p4 }
  0x35   : > { %p2270_p13 = pnand %p2269_p12, %p2263_p10 }
  0x37   : > { %2273 = shalt.err (!%p2270_p13)
}
  0x38   : > { %s3122_s13 = smov 64   ;;  %s3124_s24 = smov 4  }
  0x39   : > { %2129 = dma.hbm_to_vmem [thread:$0]  (!%p2595_p7), %s2604_s21, 256, %s2607_s17, %s2609_s22, %s3122_s13, %s3122_s13, %s3124_s24  }
  0x3a   : > { %s2643_s20 = sadd.s32 4294967295, %s2452_s18   ;;  %s1882_s27 = sadd.s32 4294967294, %s2452_s18  }
  0x3b   : > { %p103_p1 = scmp.ne.s32.totalorder %s2436_s30, %s2432_s29  ;;  %p3132_p4 = scmp.eq.s32.totalorder %s2643_s20, 0 }
  0x3c   : > { %p395_p11 = scmp.eq.s32.totalorder %s2643_s20, 1  ;;  %p401_p0 = scmp.eq.s32.totalorder %s1882_s27, 1 }
  0x3d   : > { %p1883_p2 = scmp.ge.s32.totalorder %s2452_s18, 1  ;;  %p2653_p3 = por %p3132_p4, %p103_p1 }
  0x3e   : > { %p3159_p5 = scmp.ne.s32.totalorder %s2440_s15, %s2436_s30  ;;  %p2664_p8 = por %p401_p0, %p103_p1 }
  0x3f   : > { %s3158_s19 = scalar_select %p2653_p3, 1, 0 }
  0x40   : > { %p2660_p6 = por %p395_p11, %p3159_p5  ;;  %p408_p10 = scmp.lt.s32.totalorder %s2452_s18, 3 }
  0x41   : > { %s3162_s21 = scalar_select %p2664_p8, 1, 0 }
  0x42   : > { %s3160_s17 = scalar_select %p2660_p6, 1, 0 }
  0x43   : > { %3163 = sst [smem:[#allocation25_spill]] %s3162_s21  ;;  %p2669_p12 = pnand %p1883_p2, %p408_p10 }
  0x44   : > { %3161 = sst [smem:[#allocation24_spill]] %s3160_s17  ;;  %s2457_s12 = smov [#allocation11]  }
  0x45   : > { %s3164_s28 = scalar_select %p2669_p12, 1, 0 }
  0x46   : > { %s432_s27 = sshll.u32 %s2457_s12, 4  ;;  %p2119_p13 = pneg %p2669_p12  ;;  %s2673_s27 = int_to_ptr.vmem [resolvable:$true] %s432_s27 }
  0x47   : > { %s3165_s1 = sld [smem:[#allocation26_spill]]  ;;  %s475_s18 = scalar_lea.vmem [#allocation5], %s2593_s25 }
  0x48   : > { %s483_s21 = sshll.u32 %s475_s18, 4  ;;  %p2686_p1 = pnand %p2119_p13, %p3132_p4  ;;  %s2690_s21 = int_to_ptr.vmem [resolvable:$true] %s483_s21 }
  0x49   : > { %s3167_s12 = sand.u32 1, %s2440_s15  }
  0x4a   : > { %s3166_s29 = scalar_select %p2686_p1, 1, 0 }
  0x4b   : > { %s2694_s17 = scalar_lea.sflag [#allocation6], %s3167_s12 }
  0x4d   : > { %s2681_s2 = scalar_lea.hbm %s3165_s1, %s2586_s23  ;;  %s2279_s9 = scalar_lea.hbm %s3165_s1, 512 }
  0x4e   : > { %s2274_s11 = scalar_lea.hbm %s2681_s2, 256  ;;  %p2280_p5 = scmp.lt.u32.totalorder %s2681_s2, %s3165_s1 }
  0x4f   : > { %p2275_p11 = scmp.ne.s32.totalorder %s2681_s2, %s2274_s11  ;;  %p2281_p10 = scmp.lt.u32.totalorder %s2279_s9, %s2274_s11 }
  0x50   : > { %p2283_p4 = scmp.lt.u32.totalorder %s2274_s11, %s2681_s2 }
  0x51   : > { %p2277_p0 = pnand %p2275_p11, %p2615_p9  ;;  %p2282_p13 = por %p2281_p10, %p2280_p5 }
  0x53   : > { %p2278_p2 = pneg %p2277_p0  ;;  %p2284_p8 = por %p2283_p4, %p2282_p13 }
  0x55   : > { %p2285_p6 = pnand %p2284_p8, %p2278_p2 }
  0x57   : > { %2288 = shalt.err (!%p2285_p6)
}
  0x58   : > { %s2289_s12 = scalar_lea.vmem %s2690_s21, 256  ;;  %s2458_s13 = smov [#allocation5]  }
  0x59   : > { %p2290_p11 = scmp.ne.s32.totalorder %s2690_s21, %s2289_s12  ;;  %s2294_s24 = sshll.u32 %s2458_s13, 4  ;;  %s2295_s24 = int_to_ptr.vmem [resolvable:$false] %s2294_s24 }
  0x5a   : > { %s2296_s7 = scalar_lea.vmem %s2295_s24, 512  ;;  %p2297_p12 = scmp.lt.s32.totalorder %s2690_s21, %s2295_s24 }
  0x5b   : > { %p2292_p0 = pnand %p2290_p11, %p2615_p9  ;;  %p2298_p1 = scmp.lt.s32.totalorder %s2296_s7, %s2289_s12 }
  0x5d   : > { %p2293_p3 = pneg %p2292_p0  ;;  %p2299_p5 = por %p2298_p1, %p2297_p12 }
  0x5f   : > { %p2300_p10 = pnand %p2299_p5, %p2293_p3 }
  0x61   : > { %2303 = shalt.err (!%p2300_p10)
}
  0x62   : > { %s3168_s9 = smov 4   ;;  %s3169_s11 = smov 64  }
  0x63   : > { %2126 = dma.hbm_to_vmem [thread:$0]  (!%p2595_p7), %s2681_s2, 256, %s2690_s21, %s2694_s17, %s3169_s11, %s3169_s11, %s3168_s9  }
  0x64   : > { %s2304_s13 = scalar_lea.hbm %s3110_s8, 256  ;;  %p3170_p3 = scmp.ne.s32.totalorder %s3166_s29, 0 }
  0x65   : > { %p2305_p4 = scmp.ne.s32.totalorder %s3110_s8, %s2304_s13  ;;  %p2311_p1 = scmp.lt.u32.totalorder %s2304_s13, %s3110_s8 }
  0x66   : > { %p2306_p6 = pneg %p3170_p3 }
  0x68   : > { %p2307_p8 = pnand %p2306_p6, %p2305_p4 }
  0x6a   : > { %p2308_p12 = pneg %p2307_p8 }
  0x6c   : > { %p2313_p2 = pnand %p2311_p1, %p2308_p12 }
  0x6e   : > { %2316 = shalt.err (!%p2313_p2)
}
  0x6f   : > { %s2317_s2 = scalar_lea.vmem %s2673_s27, 256  ;;  %p2325_p5 = scmp.lt.s32.totalorder %s2673_s27, %s2673_s27 }
  0x70   : > { %p2318_p13 = scmp.ne.s32.totalorder %s2673_s27, %s2317_s2  ;;  %p2326_p10 = scmp.lt.s32.totalorder %s2317_s2, %s2317_s2 }
  0x72   : > { %p2320_p11 = pnand %p2318_p13, %p2306_p6  ;;  %p2327_p7 = por %p2326_p10, %p2325_p5 }
  0x74   : > { %p2321_p0 = pneg %p2320_p11 }
  0x76   : > { %p2328_p9 = pnand %p2327_p7, %p2321_p0 }
  0x78   : > { %2331 = shalt.err (!%p2328_p9)
}
  0x79   : > { %2122 = dma.hbm_to_vmem [thread:$0]  (!%p3170_p3), %s3110_s8, 256, %s2673_s27, [#allocation12], %s3169_s11, %s3169_s11, %s3168_s9  }
  0x7a   : > { %s2749_s18 = scalar_lea.hbm %s3105_s3, %s2586_s23  ;;  %s519_s29 = scalar_lea.vmem [#allocation10], %s2593_s25 }
  0x7b   : > { %s527_s13 = sshll.u32 %s519_s29, 4  ;;  %s2332_s24 = scalar_lea.hbm %s2749_s18, 256  ;;  %s2752_s13 = int_to_ptr.vmem [resolvable:$true] %s527_s13 }
  0x7c   : > { %p2333_p7 = scmp.ne.s32.totalorder %s2749_s18, %s2332_s24  ;;  %p3171_p9 = scmp.ne.s32.totalorder %s3157_s14, 0 }
  0x7d   : > { %s2337_s7 = scalar_lea.hbm %s3105_s3, 512  ;;  %p2338_p3 = scmp.lt.u32.totalorder %s2749_s18, %s3105_s3 }
  0x7e   : > { %p2335_p4 = pnand %p2333_p7, %p3171_p9  ;;  %p2339_p8 = scmp.lt.u32.totalorder %s2337_s7, %s2332_s24 }
  0x7f   : > { %p2341_p1 = scmp.lt.u32.totalorder %s2332_s24, %s2749_s18 }
  0x80   : > { %p2336_p6 = pneg %p2335_p4  ;;  %p2340_p12 = por %p2339_p8, %p2338_p3 }
  0x82   : > { %p2342_p2 = por %p2341_p1, %p2340_p12 }
  0x84   : > { %p2343_p13 = pnand %p2342_p2, %p2336_p6 }
  0x86   : > { %2346 = shalt.err (!%p2343_p13)
}
  0x87   : > { %s2347_s25 = scalar_lea.vmem %s2752_s13, 256  ;;  %s2459_s1 = smov [#allocation10]  }
  0x88   : > { %p2348_p11 = scmp.ne.s32.totalorder %s2752_s13, %s2347_s25  ;;  %s2352_s15 = sshll.u32 %s2459_s1, 4  ;;  %s2353_s15 = int_to_ptr.vmem [resolvable:$false] %s2352_s15 }
  0x89   : > { %s2354_s17 = scalar_lea.vmem %s2353_s15, 512  ;;  %p2355_p10 = scmp.lt.s32.totalorder %s2752_s13, %s2353_s15 }
  0x8a   : > { %p2350_p0 = pnand %p2348_p11, %p3171_p9  ;;  %p2356_p7 = scmp.lt.s32.totalorder %s2354_s17, %s2347_s25 }
  0x8c   : > { %p2351_p5 = pneg %p2350_p0  ;;  %p2357_p4 = por %p2356_p7, %p2355_p10 }
  0x8e   : > { %p2358_p3 = pnand %p2357_p4, %p2351_p5 }
  0x90   : > { %2361 = shalt.err (!%p2358_p3)
}
  0x91   : > { %p3172_p6 = scmp.ne.s32.totalorder %s3155_s26, 0  ;;  %p3173_p9 = scmp.ne.s32.totalorder %s3164_s28, 0 }
  0x92   : > { %s2782_s14 = sand.u32 (!%p3173_p9), 1, %s2436_s30   ;;  %p3174_p8 = scmp.ne.s32.totalorder (!%p3173_p9), %s3158_s19, 0 }
  0x93   : > { %2132 = dma.hbm_to_vmem [thread:$0]  (!%p3172_p6), %s2749_s18, 256, %s2752_s13, %s2609_s22, %s3169_s11, %s3169_s11, %s3168_s9  }
  0x94   : > { %539 = sbr.rel (%p3173_p9) target bundleno = 2282 (0x8ea), region = 76  ;;  %s1896_s21 = sshll.u32 (!%p3173_p9), %s2782_s14, 4 }
  0x95   : > { %s542_s29 = scalar_lea.sflag (!%p3173_p9), [#allocation6], %s2782_s14  ;;  %s2786_s24 = scalar_lea.vmem (!%p3173_p9), [#allocation5], %s1896_s21 }
  0x9b   : > { %2415 = dma.done.wait (%p3174_p8), %s542_s29, 256  }
  0x9c   : > { %2417 = vsyncadd (%p3174_p8), %s542_s29, 4294967040  ;;  %s550_s22 = sand.u32 1, %s2643_s20   ;;  %s2793_s28 = scalar_lea.vmem [#allocation8], %s1896_s21 }
  0x9d   : > { %s551_s26 = scalar_lea.sflag [#allocation9], %s550_s22 }
  0x9e   : > { %2419 = dma.done.wait (%p3174_p8), %s551_s26, 512  }
  0x9f   : > { %2421 = vsyncadd (%p3174_p8), %s551_s26, 4294966784  ;;  %s2799_s9 = scalar_lea.vmem [#allocation10], %s1896_s21  ;;  %p3175_p12 = scmp.eq.s32.totalorder %s2643_s20, 0 }
  0xa1   : > { %2423 = dma.done.wait (%p3175_p12), [#allocation12], 256   ;;  %p3176_p1 = pmov %p3175_p12 }
  0xa2   : > { %vm650_vm0 = vcmask 261120   ;;  %v2460_v0 = vmov 0.0   ;;  %vm2461_vm1 = vmmov 0   ;;  %v659_v1 = vld [vmem:[%s2793_s28] sm:$0xf]  ;;  %vm641_vm2 = vcmask 7168  }
  0xa3   : > { %2425 = vsyncadd (%p3176_p1), [#allocation12], 4294967040  ;;  %1999 = vmatprep.subr.bf16.mxu0 %v2460_v0  ;;  %651 = vst.msk [vmem:[#allocation4] sm:$0xff] %vm650_vm0, %v2460_v0  ;;  %2001 = vmatprep.mubr.msk.bf16.mxu0 %vm2461_vm1, %v2460_v0  ;;  %v660_v2 = vld [vmem:[%s2793_s28 + $0x4] sm:$0xf]  ;;  %v668_v3 = vsel %vm650_vm0, %v659_v1, 0 }
  0xa4   : > { %652 = vst.msk [vmem:[#allocation4 + $0x8] sm:$0xff] %vm650_vm0, %v2460_v0  ;;  %653 = vst.msk [vmem:[#allocation4 + $0x10] sm:$0xff] %vm650_vm0, %v2460_v0  ;;  %2017 = vmatprep.subr.bf16.mxu1 %v2460_v0  ;;  %2019 = vmatprep.mubr.msk.bf16.mxu1 %vm2461_vm1, %v2460_v0  ;;  %v662_v4 = vld [vmem:[%s2793_s28 + $0xc] sm:$0xf]  ;;  %v714_v5 = vsel %vm650_vm0, %v660_v2, 0  ;;  %v2462_v13 = vmov -inf  }
  0xa5   : > { %654 = vst.msk [vmem:[#allocation4 + $0x18] sm:$0xff] %vm650_vm0, %v2460_v0  ;;  %2000 = vmatpush3.bf16.xpose.msra.mxu0 %v668_v3  ;;  %v806_v6 = vsel %vm650_vm0, %v662_v4, 0  ;;  %v655_v7 = vld [vmem:[%s2786_s24] sm:$0xf]  ;;  %v658_v8 = vld [vmem:[%s2786_s24 + $0xc] sm:$0xf] }
  0xa6   : > { %2005 = vmatprep.subr.bf16.mxu0 %v2460_v0  ;;  %2018 = vmatpush3.bf16.xpose.msra.mxu1 %v806_v6  ;;  %v661_v9 = vld [vmem:[%s2793_s28 + $0x8] sm:$0xf]  ;;  %v656_v10 = vld [vmem:[%s2786_s24 + $0x4] sm:$0xf]  ;;  %642 = vst.msk [vmem:[#allocation2] sm:$0xff] %vm641_vm2, %v2462_v13  ;;  %643 = vst.msk [vmem:[#allocation2 + $0x8] sm:$0xff] %vm641_vm2, %v2462_v13 }
  0xa7   : > { %2029 = vmatprep.subr.bf16.mxu1 %v2460_v0  ;;  %v760_v11 = vsel %vm650_vm0, %v661_v9, 0  ;;  %v657_v12 = vld [vmem:[%s2786_s24 + $0x8] sm:$0xf]  ;;  %644 = vst.msk [vmem:[#allocation2 + $0x10] sm:$0xff] %vm641_vm2, %v2462_v13  ;;  %645 = vst.msk [vmem:[#allocation2 + $0x18] sm:$0xff] %vm641_vm2, %v2462_v13  ;;  %vm852_vm3 = vcmask 64512  }
  0xa8   : > { %646 = vst.msk [vmem:[#allocation3] sm:$0xff] %vm641_vm2, %v2460_v0  ;;  %647 = vst.msk [vmem:[#allocation3 + $0x8] sm:$0xff] %vm641_vm2, %v2460_v0  ;;  %v2463_v31 = vmov 0   ;;  %v974_v44 = vld [vmem:[%s2799_s9] sm:$0xf]  ;;  %vm981_vm4 = vcmask 1043456  }
  0xa9   : > { %648 = vst.msk [vmem:[#allocation3 + $0x10] sm:$0xff] %vm641_vm2, %v2460_v0  ;;  %649 = vst.msk [vmem:[#allocation3 + $0x18] sm:$0xff] %vm641_vm2, %v2460_v0  ;;  %2196 = vset.pattern.permute.xlu0 %v2463_v31  ;;  %2197 = vset.pattern.permute.xlu1 %v2463_v31  ;;  %v983_v46 = vsel %vm981_vm4, %v974_v44, 0  ;;  %v975_v53 = vld [vmem:[%s2799_s9 + $0x4] sm:$0xf]  ;;  %p629_p2 = scmp.lt.s32.totalorder %s2444_s16, 1 }
  0xaa   : > { %v1029_v54 = vsel %vm981_vm4, %v975_v53, 0  ;;  %v976_v61 = vld [vmem:[%s2799_s9 + $0x8] sm:$0xf]  ;;  %s3177_s26 = sld [smem:[#allocation28_spill]]  ;;  %s3178_s13 = sld [smem:[#allocation29_spill]] }
  0xab   : > { %v1075_v3 = vsel %vm981_vm4, %v976_v61, 0  ;;  %s630_s24 = scalar_select %p629_p2, %s2444_s16, 1 }
  0xac   : > { %2002 = vmatmul.mubr.msk.bf16.vlgmr.msra.gmra.mrb[0].mxu0 %vm650_vm0, %v655_v7  ;;  %s3179_s7 = sld [smem:[#allocation30_spill]]  ;;  %s1900_s2 = sshll.u32 %s2782_s14, 3 }
  0xad   : > { %2006 = vmatpush3.bf16.xpose.msra.mxu0 %v714_v5  ;;  %2007 = vmatprep.mubr.msk.bf16.mxu0 %vm2461_vm1, %v2460_v0  ;;  %v848_v35 = vld [vmem:[#allocation2] sm:$0xff]  ;;  %v2867_v39 = vld [vmem:[#allocation2 + $0x8] sm:$0xff]  ;;  %s1901_s22 = sshll.u32 %s630_s24, 3  ;;  %s3180_s23 = sld [smem:[#allocation24_spill]] }
  0xae   : > { %2011 = vmatprep.subr.bf16.mxu0 %v2460_v0  ;;  %2020 = vmatmul.mubr.msk.bf16.vlgmr.msra.gmra.mrb[0].mxu1 %vm650_vm0, %v658_v8  ;;  %v2877_v43 = vld [vmem:[#allocation2 + $0x10] sm:$0xff]  ;;  %v2884_v48 = vld [vmem:[#allocation2 + $0x18] sm:$0xff]  ;;  %s3181_s15 = sld [smem:[#allocation31_spill]]  ;;  %s3182_s29 = sld [smem:[#allocation32_spill]] }
  0xaf   : > { %2031 = vmatprep.mubr.msk.bf16.mxu1 %vm2461_vm1, %v2460_v0  ;;  %2030 = vmatpush3.bf16.msra.mxu1 %v1029_v54  ;;  %v977_v8 = vld [vmem:[%s2799_s9 + $0xc] sm:$0xf]  ;;  %s635_s9 = scalar_lea.vmem %s3102_s0, %s1901_s22  ;;  %s1953_s24 = sshll.u32 %s2444_s16, 7 }
  0xb0   : > { %2041 = vmatprep.subr.bf16.mxu1 %v2460_v0  ;;  %s628_s22 = scalar_lea.vmem [#allocation13], %s1900_s2  ;;  %s3183_s20 = sld [smem:[#allocation33_spill]] }
  0xb1   : > { %s1711_s11 = scalar_lea.sflag [#allocation7], %s2782_s14  ;;  %s2464_s16 = smov [#allocation13]  }
  0xb3   : > { %p3184_p11 = scmp.ne.s32.totalorder %s3180_s23, 0 }
  0xb4   : > { %2008 = vmatmul.mubr.msk.bf16.vlgmr.msra.gmra.mrb[4].mxu0 %vm650_vm0, %v656_v10 }
  0xb5   : > { %2012 = vmatpush3.bf16.xpose.msra.mxu0 %v760_v11  ;;  %2013 = vmatprep.mubr.msk.bf16.mxu0 %vm2461_vm1, %v2460_v0 }
  0xb6   : > { %2023 = vmatprep.subr.bf16.mxu0 %v2460_v0  ;;  %s3052_s19 = scalar_lea.hbm %s3183_s20, %s1953_s24 }
  0xbc   : > { %2014 = vmatmul.mubr.msk.bf16.vlgmr.msra.gmra.mrb[8].mxu0 %vm650_vm0, %v657_v12 }
  0xbd   : > { %2025 = vmatprep.mubr.msk.bf16.mxu0 %vm2461_vm1, %v2460_v0  ;;  %2024 = vmatpush3.bf16.msra.mxu0 %v983_v46 }
  0xbe   : > { %2035 = vmatprep.subr.bf16.mxu0 %v2460_v0 }
 0x17f   : > { %v704_v14 = vpop.f32.mrb[0].mxu0 }
 0x180   : > { %v2003_v15 = vpop.f32.mrb[1].mxu0  ;;  %v853_v16 = vsel %vm852_vm3, %v704_v14, -inf }
 0x181   : > { %854 = vmax.xlane.f32.xlu0 %v853_v16  ;;  %v707_v17 = vpop.f32.mrb[2].mxu0  ;;  %v2860_v18 = vpop.f32.mrb[0].mxu1 }
 0x182   : > { %v2004_v19 = vpop.f32.mrb[3].mxu0  ;;  %v2021_v20 = vpop.f32.mrb[1].mxu1  ;;  %v862_v34 = vsel %vm852_vm3, %v2860_v18, -inf }
 0x183   : > { %v845_v21 = vpop.f32.mrb[2].mxu1 }
 0x184   : > { %v2022_v22 = vpop.f32.mrb[3].mxu1 }
 0x187   : > { %v750_v23 = vpop.f32.mrb[4].mxu0 }
 0x188   : > { %v2009_v24 = vpop.f32.mrb[5].mxu0  ;;  %v856_v25 = vsel %vm852_vm3, %v750_v23, -inf }
 0x189   : > { %857 = vmax.xlane.f32.xlu0 %v856_v25  ;;  %v753_v26 = vpop.f32.mrb[6].mxu0 }
 0x18a   : > { %v2010_v27 = vpop.f32.mrb[7].mxu0 }
 0x18f   : > { %v796_v28 = vpop.f32.mrb[8].mxu0 }
 0x190   : > { %v2015_v29 = vpop.f32.mrb[9].mxu0  ;;  %v859_v30 = vsel %vm852_vm3, %v796_v28, -inf }
 0x191   : > { %860 = vmax.xlane.f32.xlu1 %v859_v30  ;;  %v799_v32 = vpop.f32.mrb[10].mxu0  ;;  %v913_v29 = vld [vmem:[#allocation3] sm:$0xff] }
 0x192   : > { %v2016_v33 = vpop.f32.mrb[11].mxu0 }
 0x193   : > { %v914_v33 = vld [vmem:[#allocation3 + $0x8] sm:$0xff] }
 0x195   : > { %863 = vmax.xlane.f32.xlu1 %v862_v34 }
 0x20e   : > { %v855_v36 = vpop.xlane.xlu0 %854 }
 0x20f   : > { %v865_v37 = vmax.f32 %v848_v35, %v855_v36 }
 0x211   : > { %v869_v38 = vsub.f32 %v848_v35, %v865_v37  ;;  %1171 = vst.msk [vmem:[#allocation2] sm:$0xff] %vm641_vm2, %v865_v37  ;;  %883 = vperm.xlu0 %2196, %v865_v37  }
 0x213   : > { %v873_v11 = vmul.f32 1.442695, %v869_v38  ;;  %v915_v38 = vld [vmem:[#allocation3 + $0x10] sm:$0xff] }
 0x216   : > { %v858_v40 = vpop.xlane.xlu0 %857 }
 0x217   : > { %v2870_v41 = vmax.f32 %v2867_v39, %v858_v40 }
 0x219   : > { %v870_v42 = vsub.f32 %v2867_v39, %v2870_v41  ;;  %1172 = vst.msk [vmem:[#allocation2 + $0x8] sm:$0xff] %vm641_vm2, %v2870_v41  ;;  %888 = vperm.xlu1 %2197, %v2870_v41   ;;  %v916_v41 = vld [vmem:[#allocation3 + $0x18] sm:$0xff] }
 0x21b   : > { %v875_v22 = vmul.f32 1.442695, %v870_v42 }
 0x21e   : > { %v861_v45 = vpop.xlane.xlu1 %860 }
 0x21f   : > { %v2882_v47 = vmax.f32 %v2877_v43, %v861_v45 }
 0x221   : > { %v871_v49 = vsub.f32 %v2877_v43, %v2882_v47  ;;  %1173 = vst.msk [vmem:[#allocation2 + $0x10] sm:$0xff] %vm641_vm2, %v2882_v47  ;;  %893 = vperm.xlu1 %2197, %v2882_v47  }
 0x222   : > { %v864_v50 = vpop.xlane.xlu1 %863 }
 0x223   : > { %v2893_v51 = vmax.f32 %v2884_v48, %v864_v50 }
 0x225   : > { %v872_v52 = vsub.f32 %v2884_v48, %v2893_v51  ;;  %1174 = vst.msk [vmem:[#allocation2 + $0x18] sm:$0xff] %vm641_vm2, %v2893_v51  ;;  %898 = vperm.xlu1 %2197, %v2893_v51   ;;  %v2199_v48 = vld [vmem:[%s3106_s4 + $0x8] sm:$0xff]  }
 0x227   : > { %v879_v24 = vmul.f32 1.442695, %v872_v52  ;;  %v2201_v52 = vld [vmem:[%s3106_s4 + $0x18] sm:$0xff]  }
 0x290   : > { %v884_v55 = vpop.permute.xlu0 %883 }
 0x291   : > { %v901_v56 = vsub.f32 %v704_v14, %v884_v55  ;;  %v1121_v14 = vsel %vm981_vm4, %v977_v8, 0 }
 0x293   : > { %v905_v57 = vmul.f32 1.442695, %v901_v56  ;;  %v942_v56 = vld [vmem:[#allocation4] sm:$0xff] }
 0x295   : > { %2216 = vpow2.f32 %v905_v57 }
 0x298   : > { %v889_v58 = vpop.permute.xlu1 %888 }
 0x299   : > { %v902_v59 = vsub.f32 %v750_v23, %v889_v58  ;;  %v877_v23 = vmul.f32 1.442695, %v871_v49  ;;  %v2200_v49 = vld [vmem:[%s3106_s4 + $0x10] sm:$0xff]  }
 0x29b   : > { %v907_v60 = vmul.f32 1.442695, %v902_v59 }
 0x29d   : > { %2218 = vpow2.f32 %v907_v60 }
 0x29f   : > { %v2217_v62 = vpop.eup %2216 }
 0x2a0   : > { %v894_v63 = vpop.permute.xlu1 %893  ;;  %v921_v1 = vsel %vm852_vm3, %v2217_v62, 0.0  ;;  %v970_v2 = vpack.c.bf16 %v2217_v62, %v2217_v62 }
 0x2a1   : > { %v903_v4 = vsub.f32 %v796_v28, %v894_v63  ;;  %922 = vadd.xlane.f32.xlu0 %v921_v1  ;;  %v2198_v28 = vld [vmem:[%s3106_s4] sm:$0xff]   ;;  %v943_v1 = vld [vmem:[#allocation4 + $0x8] sm:$0xff] }
 0x2a2   : > { %2026 = vmatmul.mubr.msk.bf16.vlgmr.msra.gmra.mrb[12].mxu0 %vm852_vm3, %v970_v2 }
 0x2a3   : > { %v909_v5 = vmul.f32 1.442695, %v903_v4  ;;  %2036 = vmatpush3.bf16.msra.mxu0 %v1075_v3  ;;  %2037 = vmatprep.mubr.msk.bf16.mxu0 %vm2461_vm1, %v2460_v0 }
 0x2a4   : > { %v899_v6 = vpop.permute.xlu1 %898  ;;  %2047 = vmatprep.subr.bf16.mxu0 %v2460_v0 }
 0x2a5   : > { %2220 = vpow2.f32 %v909_v5  ;;  %v904_v7 = vsub.f32 %v2860_v18, %v899_v6 }
 0x2a7   : > { %v2219_v9 = vpop.eup %2218  ;;  %v911_v10 = vmul.f32 1.442695, %v904_v7 }
 0x2a8   : > { %v924_v12 = vsel %vm852_vm3, %v2219_v9, 0.0  ;;  %v971_v13 = vpack.c.bf16 %v2219_v9, %v2219_v9 }
 0x2a9   : > { %2222 = vpow2.f32 %v911_v10  ;;  %925 = vadd.xlane.f32.xlu1 %v924_v12  ;;  %v944_v10 = vld [vmem:[#allocation4 + $0x10] sm:$0xff]  ;;  %v945_v12 = vld [vmem:[#allocation4 + $0x18] sm:$0xff] }
 0x2aa   : > { %2032 = vmatmul.mubr.msk.bf16.vlgmr.msra.gmra.mrb[4].mxu1 %vm852_vm3, %v971_v13  ;;  %2224 = vpow2.f32 %v873_v11 }
 0x2ab   : > { %2042 = vmatpush3.bf16.msra.mxu1 %v1121_v14  ;;  %2043 = vmatprep.mubr.msk.bf16.mxu1 %vm2461_vm1, %v2460_v0  ;;  %2226 = vpow2.f32 %v875_v22 }
 0x2ac   : > { %2055 = vmatprep.subr.bf16.mxu1 %v2460_v0  ;;  %2228 = vpow2.f32 %v877_v23 }
 0x2ad   : > { %2230 = vpow2.f32 %v879_v24 }
 0x2af   : > { %v2221_v15 = vpop.eup %2220 }
 0x2b0   : > { %v927_v16 = vsel %vm852_vm3, %v2221_v15, 0.0  ;;  %v972_v17 = vpack.c.bf16 %v2221_v15, %v2221_v15 }
 0x2b1   : > { %928 = vadd.xlane.f32.xlu1 %v927_v16 }
 0x2b2   : > { %2038 = vmatmul.mubr.msk.bf16.vlgmr.msra.gmra.mrb[16].mxu0 %vm852_vm3, %v972_v17 }
 0x2b3   : > { %v2223_v18 = vpop.eup %2222  ;;  %2051 = vmatprep.mubr.msk.bf16.mxu0 %vm2461_vm1, %v2460_v0  ;;  %2048 = vmatpush3.bf16.msra.mxu0 %v2200_v49 }
 0x2b4   : > { %v930_v19 = vsel %vm852_vm3, %v2223_v18, 0.0  ;;  %v973_v20 = vpack.c.bf16 %v2223_v18, %v2223_v18  ;;  %v2225_v21 = vpop.eup %2224  ;;  %2049 = vmatprep.subr.bf16.mxu0 %v2460_v0 }
 0x2b5   : > { %931 = vadd.xlane.f32.xlu1 %v930_v19  ;;  %v2227_v25 = vpop.eup %2226  ;;  %v917_v30 = vmul.f32 %v2225_v21, %v913_v29 }
 0x2b6   : > { %2044 = vmatmul.mubr.msk.bf16.vlgmr.msra.gmra.mrb[8].mxu1 %vm852_vm3, %v973_v20  ;;  %v2229_v26 = vpop.eup %2228  ;;  %v918_v34 = vmul.f32 %v2227_v25, %v914_v33 }
 0x2b7   : > { %948 = vperm.xlu0 %2196, %v2225_v21   ;;  %2059 = vmatprep.mubr.msk.bf16.mxu1 %vm2461_vm1, %v2460_v0  ;;  %v2231_v27 = vpop.eup %2230  ;;  %v919_v39 = vmul.f32 %v2229_v26, %v915_v38 }
 0x2b8   : > { %2056 = vmatpush3.bf16.msra.mxu1 %v2198_v28  ;;  %v920_v44 = vmul.f32 %v2231_v27, %v916_v41  ;;  %2050 = vmatpush3.bf16.msra.mxu0 %v2201_v52  ;;  %v2204_v28 = vld [vmem:[%s3106_s4 + $0x30] sm:$0xff]  }
 0x2b9   : > { %2057 = vmatprep.subr.bf16.mxu1 %v2460_v0  ;;  %2063 = vmatprep.subr.bf16.mxu0 %v2460_v0 }
 0x2bc   : > { %2058 = vmatpush3.bf16.msra.mxu1 %v2199_v48 }
 0x2bd   : > { %2071 = vmatprep.subr.bf16.mxu1 %v2460_v0 }
 0x2c6   : > { %953 = vperm.xlu1 %2197, %v2227_v25  }
 0x2ca   : > { %958 = vperm.xlu1 %2197, %v2229_v26  }
 0x2ce   : > { %963 = vperm.xlu1 %2197, %v2231_v27  }
 0x32e   : > { %v923_v31 = vpop.xlane.xlu0 %922 }
 0x32f   : > { %v933_v32 = vadd.f32 %v923_v31, %v917_v30  ;;  %v2205_v30 = vld [vmem:[%s3106_s4 + $0x38] sm:$0xff]  }
 0x331   : > { %938 = vst.msk [vmem:[#allocation3] sm:$0xff] %vm641_vm2, %v933_v32 }
 0x336   : > { %v926_v35 = vpop.xlane.xlu1 %925  ;;  %v949_v57 = vpop.permute.xlu0 %948 }
 0x337   : > { %v934_v36 = vadd.f32 %v926_v35, %v918_v34  ;;  %v966_v58 = vmul.f32 %v949_v57, %v942_v56  ;;  %v2202_v34 = vld [vmem:[%s3106_s4 + $0x20] sm:$0xff]  }
 0x338   : > { %v1178_v37 = vld [vmem:[#allocation3] sm:$0xff] }
 0x339   : > { %939 = vst.msk [vmem:[#allocation3 + $0x8] sm:$0xff] %vm641_vm2, %v934_v36  ;;  %2232 = vrcp.f32 %v1178_v37  ;;  %v2203_v36 = vld [vmem:[%s3106_s4 + $0x28] sm:$0xff]  }
 0x33e   : > { %v929_v40 = vpop.xlane.xlu1 %928 }
 0x33f   : > { %v935_v42 = vadd.f32 %v929_v40, %v919_v39 }
 0x340   : > { %v1179_v43 = vld [vmem:[#allocation3 + $0x8] sm:$0xff] }
 0x341   : > { %940 = vst.msk [vmem:[#allocation3 + $0x10] sm:$0xff] %vm641_vm2, %v935_v42  ;;  %2234 = vrcp.f32 %v1179_v43 }
 0x342   : > { %v932_v45 = vpop.xlane.xlu1 %931 }
 0x343   : > { %v2233_v46 = vpop.eup %2232  ;;  %v936_v47 = vadd.f32 %v932_v45, %v920_v44 }
 0x344   : > { %1192 = vperm.xlu0 %2196, %v2233_v46  }
 0x345   : > { %941 = vst.msk [vmem:[#allocation3 + $0x18] sm:$0xff] %vm641_vm2, %v936_v47 }
 0x346   : > { %v954_v2 = vpop.permute.xlu1 %953 }
 0x347   : > { %v967_v3 = vmul.f32 %v954_v2, %v943_v1  ;;  %v1467_v1 = vld [vmem:[%s635_s9] sm:$0xff] }
 0x348   : > { %v1180_v50 = vld [vmem:[#allocation3 + $0x10] sm:$0xff] }
 0x349   : > { %2236 = vrcp.f32 %v1180_v50 }
 0x34a   : > { %v959_v7 = vpop.permute.xlu1 %958 }
 0x34b   : > { %v2235_v51 = vpop.eup %2234  ;;  %v968_v11 = vmul.f32 %v959_v7, %v944_v10 }
 0x34c   : > { %1197 = vperm.xlu1 %2197, %v2235_v51   ;;  %v1181_v53 = vld [vmem:[#allocation3 + $0x18] sm:$0xff] }
 0x34d   : > { %2238 = vrcp.f32 %v1181_v53 }
 0x34e   : > { %v964_v13 = vpop.permute.xlu1 %963 }
 0x34f   : > { %v969_v18 = vmul.f32 %v964_v13, %v945_v12  ;;  %v2207_v12 = vld [vmem:[#allocation11 + $0x8] sm:$0xff]   ;;  %v2208_v13 = vld [vmem:[%s3112_s10] sm:$0xff]  }
 0x353   : > { %v2237_v54 = vpop.eup %2236 }
 0x354   : > { %1202 = vperm.xlu1 %2197, %v2237_v54  }
 0x357   : > { %v2239_v55 = vpop.eup %2238 }
 0x358   : > { %1207 = vperm.xlu0 %2196, %v2239_v55  }
 0x375   : > { %v1019_v59 = vpop.f32.mrb[12].mxu0 }
 0x376   : > { %v1163_v60 = vadd.f32 %v1019_v59, %v966_v58  ;;  %v2027_v61 = vpop.f32.mrb[13].mxu0 }
 0x377   : > { %v1022_v62 = vpop.f32.mrb[14].mxu0 }
 0x378   : > { %1167 = vst.msk [vmem:[#allocation4] sm:$0xff] %vm650_vm0, %v1163_v60  ;;  %v2028_v63 = vpop.f32.mrb[15].mxu0  ;;  %v1934_v60 = vld [vmem:[%s3107_s5] ss:$0 sm:$0xff] }
 0x37d   : > { %v1065_v4 = vpop.f32.mrb[4].mxu1 }
 0x37e   : > { %v1164_v5 = vadd.f32 %v1065_v4, %v967_v3  ;;  %v2033_v6 = vpop.f32.mrb[5].mxu1 }
 0x37f   : > { %v1068_v8 = vpop.f32.mrb[6].mxu1  ;;  %v1186_v25 = vld [vmem:[#allocation4] sm:$0xff] }
 0x380   : > { %1168 = vst.msk [vmem:[#allocation4 + $0x8] sm:$0xff] %vm650_vm0, %v1164_v5  ;;  %v2034_v9 = vpop.f32.mrb[7].mxu1 }
 0x385   : > { %v1111_v14 = vpop.f32.mrb[16].mxu0 }
 0x386   : > { %v1165_v15 = vadd.f32 %v1111_v14, %v968_v11  ;;  %v2039_v16 = vpop.f32.mrb[17].mxu0  ;;  %v2206_v11 = vld [vmem:[#allocation11] sm:$0xff]   ;;  %v2209_v14 = vld [vmem:[%s3112_s10 + $0x8] sm:$0xff]  }
 0x387   : > { %v1114_v17 = vpop.f32.mrb[18].mxu0  ;;  %v1187_v31 = vld [vmem:[#allocation4 + $0x8] sm:$0xff]  ;;  %v2211_v16 = vld [vmem:[%s3112_s10 + $0x18] sm:$0xff]  }
 0x388   : > { %1169 = vst.msk [vmem:[#allocation4 + $0x10] sm:$0xff] %vm650_vm0, %v1165_v15  ;;  %v2040_v19 = vpop.f32.mrb[19].mxu0  ;;  %v2210_v15 = vld [vmem:[%s3112_s10 + $0x10] sm:$0xff]   ;;  %v2212_v17 = vld [vmem:[%s3112_s10 + $0x20] sm:$0xff]  }
 0x389   : > { %v1157_v20 = vpop.f32.mrb[8].mxu1 }
 0x38a   : > { %v1166_v21 = vadd.f32 %v1157_v20, %v969_v18  ;;  %v2045_v22 = vpop.f32.mrb[9].mxu1  ;;  %v2213_v18 = vld [vmem:[%s3112_s10 + $0x28] sm:$0xff]  }
 0x38b   : > { %v1160_v23 = vpop.f32.mrb[10].mxu1 }
 0x38c   : > { %1170 = vst.msk [vmem:[#allocation4 + $0x18] sm:$0xff] %vm650_vm0, %v1166_v21  ;;  %v2046_v24 = vpop.f32.mrb[11].mxu1  ;;  %v1935_v23 = vld [vmem:[%s3108_s6] ss:$0 sm:$0xff] }
 0x38f   : > { %v1188_v38 = vld [vmem:[#allocation4 + $0x10] sm:$0xff] }
 0x393   : > { %v1189_v41 = vld [vmem:[#allocation4 + $0x18] sm:$0xff] }
 0x3c3   : > { %v1193_v26 = vpop.permute.xlu0 %1192 }
 0x3c4   : > { %v1210_v27 = vmul.f32 %v1193_v26, %v1186_v25  ;;  %v1936_v25 = vld [vmem:[%s3177_s26] ss:$0 sm:$0xff]  ;;  %s1725_s26 = sshll.u32 %s628_s22, 4  ;;  %s3054_s26 = int_to_ptr.vmem [resolvable:$true] %s1725_s26 }
 0x3c5   : > { %s2362_s18 = scalar_lea.vmem %s3054_s26, 128 }
 0x3c6   : > { %v1214_v29 = vpack.c.bf16 %v1210_v27, %v1210_v27  ;;  %p2363_p13 = scmp.ne.s32.totalorder %s3054_s26, %s2362_s18 }
 0x3c8   : > { %2060 = vmatmul.mubr.msk.bf16.vlgmr.msra.gmra.mrb[12].mxu1 %vm650_vm0, %v1214_v29  ;;  %v2214_v29 = vld [vmem:[%s3112_s10 + $0x30] sm:$0xff]   ;;  %p2364_p0 = pnand %p2363_p13, %p3184_p11 }
 0x3c9   : > { %2072 = vmatpush3.bf16.msra.mxu1 %v2204_v28  ;;  %2075 = vmatprep.mubr.msk.bf16.mxu1 %vm2461_vm1, %v2460_v0 }
 0x3ca   : > { %2073 = vmatprep.subr.bf16.mxu1 %v2460_v0  ;;  %p2365_p5 = pneg %p2364_p0 }
 0x3cb   : > { %v1198_v32 = vpop.permute.xlu1 %1197 }
 0x3cc   : > { %v1211_v33 = vmul.f32 %v1198_v32, %v1187_v31  ;;  %v1937_v31 = vld [vmem:[%s3178_s13] ss:$0 sm:$0xff]  ;;  %s2366_s13 = sshll.u32 %s2464_s16, 4  ;;  %s2367_s13 = int_to_ptr.vmem [resolvable:$false] %s2366_s13 }
 0x3cd   : > { %2074 = vmatpush3.bf16.msra.mxu1 %v2205_v30  ;;  %v2215_v30 = vld [vmem:[%s3112_s10 + $0x38] sm:$0xff]   ;;  %s2368_s12 = scalar_lea.vmem %s2367_s13, 256  ;;  %p2369_p10 = scmp.lt.s32.totalorder %s3054_s26, %s2367_s13 }
 0x3ce   : > { %v1215_v35 = vpack.c.bf16 %v1211_v33, %v1211_v33  ;;  %2087 = vmatprep.subr.bf16.mxu1 %v2460_v0  ;;  %p2370_p7 = scmp.lt.s32.totalorder %s2368_s12, %s2362_s18 }
 0x3d0   : > { %2052 = vmatmul.mubr.msk.bf16.vlgmr.msra.gmra.mrb[20].mxu0 %vm650_vm0, %v1215_v35  ;;  %p2371_p4 = por %p2370_p7, %p2369_p10 }
 0x3d1   : > { %2064 = vmatpush3.bf16.msra.mxu0 %v2202_v34  ;;  %2067 = vmatprep.mubr.msk.bf16.mxu0 %vm2461_vm1, %v2460_v0 }
 0x3d2   : > { %2065 = vmatprep.subr.bf16.mxu0 %v2460_v0  ;;  %p2372_p3 = pnand %p2371_p4, %p2365_p5 }
 0x3d3   : > { %v1203_v37 = vpop.permute.xlu1 %1202 }
 0x3d4   : > { %v1212_v39 = vmul.f32 %v1203_v37, %v1188_v38 }
 0x3d5   : > { %2066 = vmatpush3.bf16.msra.mxu0 %v2203_v36 }
 0x3d6   : > { %v1216_v40 = vpack.c.bf16 %v1212_v39, %v1212_v39  ;;  %2079 = vmatprep.subr.bf16.mxu0 %v2460_v0 }
 0x3d7   : > { %v1208_v42 = vpop.permute.xlu0 %1207 }
 0x3d8   : > { %v1213_v43 = vmul.f32 %v1208_v42, %v1189_v41  ;;  %2068 = vmatmul.mubr.msk.bf16.vlgmr.msra.gmra.mrb[24].mxu0 %vm650_vm0, %v1216_v40 }
 0x3d9   : > { %2083 = vmatprep.mubr.msk.bf16.mxu0 %vm2461_vm1, %v2460_v0  ;;  %2080 = vmatpush3.bf16.msra.mxu0 %v2206_v11 }
 0x3da   : > { %v1217_v44 = vpack.c.bf16 %v1213_v43, %v1213_v43  ;;  %2081 = vmatprep.subr.bf16.mxu0 %v2460_v0 }
 0x3dc   : > { %2076 = vmatmul.mubr.msk.bf16.vlgmr.msra.gmra.mrb[16].mxu1 %vm650_vm0, %v1217_v44 }
 0x3dd   : > { %2103 = vmatprep.mubr.msk.bf16.mxu1 %vm2461_vm1, %v2460_v0  ;;  %2082 = vmatpush3.bf16.msra.mxu0 %v2207_v12 }
 0x3de   : > { %2088 = vmatpush3.bf16.msra.mxu1 %v2208_v13 }
 0x3df   : > { %2089 = vmatprep.subr.bf16.mxu1 %v2460_v0 }
 0x3e2   : > { %2090 = vmatpush3.bf16.msra.mxu1 %v2209_v14 }
 0x3e3   : > { %2091 = vmatprep.subr.bf16.mxu1 %v2460_v0 }
 0x3e6   : > { %2092 = vmatpush3.bf16.msra.mxu1 %v2210_v15 }
 0x3e7   : > { %2093 = vmatprep.subr.bf16.mxu1 %v2460_v0 }
 0x3ea   : > { %2094 = vmatpush3.bf16.msra.mxu1 %v2211_v16 }
 0x3eb   : > { %2095 = vmatprep.subr.bf16.mxu1 %v2460_v0 }
 0x3ee   : > { %2096 = vmatpush3.bf16.msra.mxu1 %v2212_v17 }
 0x3ef   : > { %2097 = vmatprep.subr.bf16.mxu1 %v2460_v0 }
 0x3f2   : > { %2098 = vmatpush3.bf16.msra.mxu1 %v2213_v18 }
 0x3f3   : > { %2099 = vmatprep.subr.bf16.mxu1 %v2460_v0 }
 0x3f6   : > { %2100 = vmatpush3.bf16.msra.mxu1 %v2214_v29 }
 0x3f7   : > { %2101 = vmatprep.subr.bf16.mxu1 %v2460_v0  ;;  %v1941_v0 = vld [vmem:[%s3179_s7] ss:$0 sm:$0xff] }
 0x3fa   : > { %2102 = vmatpush3.bf16.msra.mxu1 %v2215_v30 }
 0x49b   : > { %v1331_v45 = vpop.f32.mrb[12].mxu1 }
 0x49c   : > { %v2061_v46 = vpop.f32.mrb[13].mxu1 }
 0x49d   : > { %v1334_v47 = vpop.f32.mrb[14].mxu1 }
 0x49e   : > { %v2062_v48 = vpop.f32.mrb[15].mxu1 }
 0x4a3   : > { %v1276_v49 = vpop.f32.mrb[20].mxu0 }
 0x4a4   : > { %v1332_v50 = vadd.f32 %v1331_v45, %v1276_v49  ;;  %v2053_v51 = vpop.f32.mrb[21].mxu0 }
 0x4a5   : > { %v1279_v52 = vpop.f32.mrb[22].mxu0 }
 0x4a6   : > { %v2054_v53 = vpop.f32.mrb[23].mxu0 }
 0x4ab   : > { %v1391_v54 = vpop.f32.mrb[24].mxu0 }
 0x4ac   : > { %v1397_v55 = vadd.f32 %v1391_v54, %v1332_v50  ;;  %v2069_v56 = vpop.f32.mrb[25].mxu0 }
 0x4ad   : > { %v1394_v57 = vpop.f32.mrb[26].mxu0 }
 0x4ae   : > { %v2070_v58 = vpop.f32.mrb[27].mxu0  ;;  %v1951_v57 = vld [vmem:[%s3182_s29] ss:$0 sm:$0xff] }
 0x4af   : > { %v1452_v59 = vpop.f32.mrb[16].mxu1 }
 0x4b0   : > { %v1458_v61 = vadd.f32 %v1452_v59, %v1397_v55  ;;  %v2077_v62 = vpop.f32.mrb[17].mxu1  ;;  %v1950_v55 = vld [vmem:[%s3181_s15] ss:$0 sm:$0xff] }
 0x4b1   : > { %v1455_v63 = vpop.f32.mrb[18].mxu1 }
 0x4b2   : > { %v1466_v2 = vadd.f32 %v1934_v60, %v1458_v61  ;;  %v2078_v3 = vpop.f32.mrb[19].mxu1 }
 0x4b4   : > { %v1468_v4 = vadd.f32 %v1467_v1, %v1466_v2 }
 0x4b6   : > { %v1471_v5 = vsel %vm650_vm0, %v1468_v4, 0.0 }
 0x4b7   : > { %1472 = vadd.xlane.f32.xlu1 %v1471_v5 }
 0x544   : > { %v1473_v6 = vpop.xlane.xlu1 %1472 }
 0x545   : > { %v1475_v7 = vmul.f32 0.03125, %v1473_v6 }
 0x547   : > { %v1476_v8 = vsub.f32 %v1468_v4, %v1475_v7 }
 0x549   : > { %v1477_v9 = vmul.f32 %v1476_v8, %v1476_v8 }
 0x54b   : > { %v1478_v10 = vsel %vm650_vm0, %v1477_v9, 0.0 }
 0x54c   : > { %1479 = vadd.xlane.f32.xlu0 %v1478_v10 }
 0x5d9   : > { %v1480_v19 = vpop.xlane.xlu0 %1479 }
 0x5da   : > { %v1481_v20 = vmul.f32 0.03125, %v1480_v19 }
 0x5dc   : > { %v1482_v21 = vadd.f32 1e-05, %v1481_v20 }
 0x5de   : > { %2240 = vrsqrt.f32 %v1482_v21 }
 0x5e8   : > { %v2241_v22 = vpop.eup %2240 }
 0x5e9   : > { %v1484_v24 = vmul.f32 %v2241_v22, %v1476_v8 }
 0x5eb   : > { %v1491_v26 = vmul.f32 %v1935_v23, %v1484_v24 }
 0x5ed   : > { %v1498_v27 = vadd.f32 %v1936_v25, %v1491_v26 }
 0x5ef   : > { %v1499_v28 = vpack.c.bf16 %v1498_v27, %v1498_v27 }
 0x5f1   : > { %2084 = vmatmul.mubr.msk.bf16.vlgmr.msra.gmra.mrb[28].mxu0 %vm650_vm0, %v1499_v28 }
 0x6c4   : > { %v1560_v32 = vpop.f32.mrb[28].mxu0 }
 0x6c5   : > { %v1561_v33 = vadd.f32 %v1937_v31, %v1560_v32  ;;  %v2085_v34 = vpop.f32.mrb[29].mxu0 }
 0x6c6   : > { %v1563_v35 = vpop.f32.mrb[30].mxu0 }
 0x6c7   : > { %v1566_v36 = vmax.f32 %v1561_v33, 0.0  ;;  %v2086_v37 = vpop.f32.mrb[31].mxu0 }
 0x6c9   : > { %v1567_v38 = vpack.c.bf16 %v1566_v36, %v1566_v36 }
 0x6cb   : > { %2104 = vmatmul.mubr.bf16.vlgmr.msra.gmra.mrb[20].mxu1 %v1567_v38 }
 0x79e   : > { %v1673_v39 = vpop.f32.mrb[20].mxu1 }
 0x79f   : > { %v1674_v40 = vadd.f32 %v1941_v0, %v1673_v39  ;;  %v2105_v41 = vpop.f32.mrb[21].mxu1 }
 0x7a0   : > { %v1676_v42 = vpop.f32.mrb[22].mxu1 }
 0x7a1   : > { %v2106_v43 = vpop.f32.mrb[23].mxu1  ;;  %v1679_v44 = vadd.f32 %v1674_v40, %v1498_v27 }
 0x7a3   : > { %v1682_v45 = vsel %vm650_vm0, %v1679_v44, 0.0 }
 0x7a4   : > { %1683 = vadd.xlane.f32.xlu0 %v1682_v45 }
 0x831   : > { %v1684_v46 = vpop.xlane.xlu0 %1683 }
 0x832   : > { %v1685_v47 = vmul.f32 0.03125, %v1684_v46 }
 0x834   : > { %v1686_v48 = vsub.f32 %v1679_v44, %v1685_v47 }
 0x836   : > { %v1687_v49 = vmul.f32 %v1686_v48, %v1686_v48 }
 0x838   : > { %v1688_v50 = vsel %vm650_vm0, %v1687_v49, 0.0 }
 0x839   : > { %1689 = vadd.xlane.f32.xlu1 %v1688_v50 }
 0x8c6   : > { %v1690_v51 = vpop.xlane.xlu1 %1689 }
 0x8c7   : > { %v1691_v52 = vmul.f32 0.03125, %v1690_v51 }
 0x8c9   : > { %v1692_v53 = vadd.f32 1e-05, %v1691_v52 }
 0x8cb   : > { %2242 = vrsqrt.f32 %v1692_v53 }
 0x8d5   : > { %v2243_v54 = vpop.eup %2242 }
 0x8d6   : > { %v1694_v56 = vmul.f32 %v2243_v54, %v1686_v48 }
 0x8d8   : > { %v1701_v58 = vmul.f32 %v1950_v55, %v1694_v56 }
 0x8da   : > { %v1708_v59 = vadd.f32 %v1951_v57, %v1701_v58 }
 0x8dc   : > { %1709 = vst.msk [vmem:[%s628_s22] sm:$0xff] %vm650_vm0, %v1708_v59 }
 0x8dd   : > { %2375 = shalt.err (!%p2372_p3)
}
 0x8de   : > { %s2376_s14 = scalar_lea.hbm %s3052_s19, 128  ;;  %s2380_s2 = scalar_lea.hbm %s3183_s20, 256 }
 0x8df   : > { %p2377_p6 = scmp.ne.s32.totalorder %s3052_s19, %s2376_s14  ;;  %p2381_p12 = scmp.lt.u32.totalorder %s3052_s19, %s3183_s20 }
 0x8e0   : > { %p2382_p1 = scmp.lt.u32.totalorder %s2380_s2, %s2376_s14  ;;  %p2384_p13 = scmp.lt.u32.totalorder %s2376_s14, %s3052_s19 }
 0x8e1   : > { %p2378_p9 = pnand %p2377_p6, %p3184_p11 }
 0x8e2   : > { %p2383_p2 = por %p2382_p1, %p2381_p12 }
 0x8e3   : > { %p2379_p8 = pneg %p2378_p9 }
 0x8e4   : > { %p2385_p0 = por %p2384_p13, %p2383_p2 }
 0x8e6   : > { %p2386_p5 = pnand %p2385_p0, %p2379_p8 }
 0x8e8   : > { %2389 = shalt.err (!%p2386_p5)
}
 0x8e9   : > { %2117 = dma.vmem_to_hbm [thread:$0]  (%p3184_p11), %s3054_s26, 128, %s3052_s19, %s1711_s11  }
 0x8ea PF: > { %s3185_s15 = sld [smem:[#allocation18_spill]]  ;;  %s3186_s17 = sld [smem:[#allocation25_spill]] }
 0x8eb   : > { %s3187_s21 = sld [smem:[#allocation21_spill]] }
 0x8f0   : > { %s1737_s29 = sand.u32 1, %s3185_s15   ;;  %p3188_p10 = scmp.ne.s32.totalorder %s3186_s17, 0 }
 0x8f1   : > { %p3189_p7 = scmp.ge.s32.totalorder %s3187_s21, 2  ;;  %s1738_s24 = scalar_lea.sflag [#allocation7], %s1737_s29 }
 0x8f3   : > { %p2134_p4 = pnand %p3189_p7, %p3188_p10 }
 0x8f5   : > { %2427 = dma.done.wait (!%p2134_p4), %s1738_s24, 128  }
 0x8f6   : > { %2429 = vsyncadd (!%p2134_p4), %s1738_s24, 4294967168  ;;  %s34_s18 = sadd.s32 1, %s3187_s21   ;;  %s3190_s22 = sld [smem:[#allocation19_spill]] }
 0x8f7   : > { %p31_p3 = scmp.ge.s32.totalorder %s34_s18, 4   ;;  %s3191_s15 = sld [smem:[#allocation23_spill]] }
 0x8f8   : > { %s3192_s16 = sld [smem:[#allocation20_spill]]  ;;  %s3193_s17 = sld [smem:[#allocation22_spill]] }
 0x8f9   : > { %s3194_s29 = smov %s2436_s30  ;;  %33 = sbr.rel (!%p31_p3) target bundleno = 18 (0x12), region = 163 }
 0x8fc   : > { %s3195_s30 = smov %s3190_s22 }
 0x900   :  { %1743 = vsyncpa [#allocation6], 1 }
 0x901   :  { %1745 = vsyncpa [#allocation6 + $0x1], 1 }
 0x902   :  { %1746 = vsyncpa [#allocation9], 1 }
 0x903   :  { %1748 = vsyncpa [#allocation9 + $0x1], 1 }
 0x904   :  { %1749 = vsyncpa [#allocation12], 1 }
 0x905   :  { %1750 = vsyncpa [#allocation7], 1 }
 0x906   :  { %1752 = vsyncpa [#allocation7 + $0x1], 1 }

</bundles_post_ra>
